<compile_context>
chip_gen: v5e
topology: v5e:2x2
jax: 0.10.0
libtpu: 0.0.40
codegen_flags: <defaults>
</compile_context>

<pallas_src>
import functools

import jax
import jax.numpy as jnp
from jax.experimental import pallas as pl
from jax.experimental.pallas import tpu as pltpu

# ---------------- synthetic BERT config (small) ----------------
VOCAB      = 64
TYPE_VOCAB = 2
MAX_POS    = 16
HIDDEN     = 32
N_HEADS    = 2
HEAD_DIM   = HIDDEN // N_HEADS
INTER      = 64          # feed-forward intermediate size
N_LAYERS   = 2
LN_EPS     = 1e-12
OUT_WIDTH  = 128         # lane-dense packed head output: [qa(1) | emb(H) | pooled(H) | pad]


# ---------------- small in-kernel helpers ----------------
def _layer_norm(x, gamma, beta):
    mu = jnp.mean(x, axis=-1, keepdims=True)
    var = jnp.mean(jnp.square(x - mu), axis=-1, keepdims=True)
    return (x - mu) * jax.lax.rsqrt(var + LN_EPS) * gamma + beta


def _gelu(x):
    # TODO(synk): HF BERT uses exact erf-gelu; tanh approximation used for robust TPU lowering.
    return 0.5 * x * (1.0 + jnp.tanh(0.7978845608028654 * (x + 0.044715 * x * x * x)))


# ---------------- fully fused forward kernel ----------------
def fused_forward_kernel(ids_ref, types_ref, mask_ref,
                         word_ref, pos_ref, type_ref, eg_ref, eb_ref,
                         wqkv_ref, bqkv_ref, wo_ref, bo_ref, ln1g_ref, ln1b_ref,
                         w1_ref, b1_ref, w2_ref, b2_ref, ln2g_ref, ln2b_ref,
                         pw_ref, pb_ref, qw1_ref, qb1_ref, qw2t_ref, qb2_ref,
                         ew_ref, ebias_ref,
                         out_ref):
    B, S = mask_ref.shape
    BS = B * S
    H = HIDDEN

    # ---- embeddings (gathers done in-kernel on VMEM-resident tables) ----
    # word embedding: one-hot [BS, VOCAB] @ table [VOCAB, H]
    ids = jnp.broadcast_to(ids_ref[...], (BS, VOCAB))                       # [BS, VOCAB] (i32)
    vocab_iota = jax.lax.broadcasted_iota(jnp.int32, (BS, VOCAB), 1)
    word_oh = (ids == vocab_iota).astype(jnp.float32)
    word_e = jnp.dot(word_oh, word_ref[...], preferred_element_type=jnp.float32)   # [BS, H]

    # token-type embedding: TYPE_VOCAB == 2 -> simple select between the two rows
    te = type_ref[...]                                                      # [2, H]
    cond = jnp.broadcast_to(types_ref[...] == 0, (BS, H))
    type_e = jnp.where(cond,
                       jnp.broadcast_to(te[0:1, :], (BS, H)),
                       jnp.broadcast_to(te[1:2, :], (BS, H)))               # [BS, H]

    # position embedding: tile the [S, H] block B times along the row (sublane) axis
    pos_blk = pos_ref[0:S, :]                                               # [S, H]
    pos_e = jnp.concatenate([pos_blk] * B, axis=0)                          # [BS, H]

    h = _layer_norm(word_e + pos_e + type_e, eg_ref[...], eb_ref[...])      # [BS, H]

    # ---- additive attention-mask bias, hoisted & pre-broadcast ONCE ----
    bias3 = jnp.broadcast_to(((1.0 - mask_ref[...]) * -1e9)[:, None, :], (B, S, S))

    scale = 1.0 / (HEAD_DIM ** 0.5)

    # ---- encoder layers (unrolled, weights indexed along the stacked layer axis) ----
    for l in range(N_LAYERS):
        # packed QKV projection: one [BS,H] x [H,3H] matmul
        qkv = jnp.dot(h, wqkv_ref[l], preferred_element_type=jnp.float32) + bqkv_ref[l]  # [BS,3H]
        q3 = qkv[:, 0 * H:1 * H].reshape(B, S, H)
        k3 = qkv[:, 1 * H:2 * H].reshape(B, S, H)
        v3 = qkv[:, 2 * H:3 * H].reshape(B, S, H)

        ctx_heads = []
        for hh in range(N_HEADS):
            sl = slice(hh * HEAD_DIM, (hh + 1) * HEAD_DIM)
            qh, kh, vh = q3[:, :, sl], k3[:, :, sl], v3[:, :, sl]
            s_ = jnp.einsum('bqd,bkd->bqk', qh, kh,
                            preferred_element_type=jnp.float32) * scale
            s_ = s_ + bias3
            s_ = s_ - jnp.max(s_, axis=-1, keepdims=True)
            p = jnp.exp(s_)
            p = p * pl.reciprocal(jnp.sum(p, axis=-1, keepdims=True), approx=True)
            ctx_heads.append(jnp.einsum('bqk,bkd->bqd', p, vh,
                                        preferred_element_type=jnp.float32))   # [B,S,dH]
        ctx = jnp.concatenate(ctx_heads, axis=-1).reshape(BS, H)                # [BS, H]

        # single output projection matmul
        attn = jnp.dot(ctx, wo_ref[l], preferred_element_type=jnp.float32) + bo_ref[l]
        h1 = _layer_norm(h + attn, ln1g_ref[l], ln1b_ref[l])                    # [BS, H]

        ff = _gelu(jnp.dot(h1, w1_ref[l], preferred_element_type=jnp.float32) + b1_ref[l])
        ff = jnp.dot(ff, w2_ref[l], preferred_element_type=jnp.float32) + b2_ref[l]
        h = _layer_norm(h1 + ff, ln2g_ref[l], ln2b_ref[l])                      # [BS, H]

    # ---- pooler + qa_classifier + embedding_projection (dropouts identity) ----
    # [CLS] rows are rows 0, S, 2S, ... of the [BS, H] slab
    cls = jnp.concatenate([h[b * S:b * S + 1, :] for b in range(B)], axis=0)    # [B, H]
    pooled = jnp.tanh(jnp.dot(cls, pw_ref[...],
                              preferred_element_type=jnp.float32) + pb_ref[...])        # [B, H]

    hq = jnp.dot(pooled, qw1_ref[...], preferred_element_type=jnp.float32) + qb1_ref[...]
    hq = jnp.maximum(hq, 0.0)                                                   # ReLU, [B, H/2]
    # final Linear(H/2 -> 1) as a lane reduction (weight stored transposed [1, H/2])
    qa = jnp.sum(hq * qw2t_ref[...], axis=-1, keepdims=True) + qb2_ref[...]     # [B, 1]

    emb = jnp.tanh(jnp.dot(pooled, ew_ref[...],
                           preferred_element_type=jnp.float32) + ebias_ref[...])        # [B, H]

    # lane-dense packed output: [qa | embeddings | pooled | zero-pad] -> [B, 128]
    pad = jnp.zeros((B, OUT_WIDTH - (1 + 2 * H)), jnp.float32)
    out_ref[...] = jnp.concatenate([qa, emb, pooled, pad], axis=-1)


# ---------------- pallas_call wrapper ----------------
_VMEM = functools.partial(pl.BlockSpec, memory_space=pltpu.MemorySpace.VMEM)
_N_INPUTS = 28


def _fused_call(params, ids2, types2, maskf, B):
    return pl.pallas_call(
        fused_forward_kernel,
        out_shape=jax.ShapeDtypeStruct((B, OUT_WIDTH), jnp.float32),
        in_specs=[_VMEM() for _ in range(_N_INPUTS)],
        out_specs=_VMEM(),
    )(ids2, types2, maskf,
      params['word_emb'], params['pos_emb'], params['type_emb'],
      params['emb_ln_g'], params['emb_ln_b'],
      params['wqkv'], params['bqkv'], params['wo'], params['bo'],
      params['ln1_g'], params['ln1_b'],
      params['w1'], params['b1'], params['w2'], params['b2'],
      params['ln2_g'], params['ln2_b'],
      params['pool_w'], params['pool_b'],
      params['qa_w1'], params['qa_b1'], params['qa_w2t'], params['qa_b2'],
      params['emb_w'], params['emb_b'])


# ---------------- parameters (deterministic synthetic init, packed layout) ----------------
def init_params(key):
    def nrm(k, shape):
        return jax.random.normal(k, shape, jnp.float32) * 0.02

    ks = iter(jax.random.split(key, 32))
    p = {
        'word_emb': nrm(next(ks), (VOCAB, HIDDEN)),
        'pos_emb':  nrm(next(ks), (MAX_POS, HIDDEN)),
        'type_emb': nrm(next(ks), (TYPE_VOCAB, HIDDEN)),
        'emb_ln_g': jnp.ones((1, HIDDEN), jnp.float32),
        'emb_ln_b': jnp.zeros((1, HIDDEN), jnp.float32),
        # stacked per-layer weights (leading dim = N_LAYERS); QKV packed as [H, 3H]
        'wqkv':  nrm(next(ks), (N_LAYERS, HIDDEN, 3 * HIDDEN)),
        'bqkv':  jnp.zeros((N_LAYERS, 1, 3 * HIDDEN), jnp.float32),
        'wo':    nrm(next(ks), (N_LAYERS, HIDDEN, HIDDEN)),
        'bo':    jnp.zeros((N_LAYERS, 1, HIDDEN), jnp.float32),
        'ln1_g': jnp.ones((N_LAYERS, 1, HIDDEN), jnp.float32),
        'ln1_b': jnp.zeros((N_LAYERS, 1, HIDDEN), jnp.float32),
        'w1':    nrm(next(ks), (N_LAYERS, HIDDEN, INTER)),
        'b1':    jnp.zeros((N_LAYERS, 1, INTER), jnp.float32),
        'w2':    nrm(next(ks), (N_LAYERS, INTER, HIDDEN)),
        'b2':    jnp.zeros((N_LAYERS, 1, HIDDEN), jnp.float32),
        'ln2_g': jnp.ones((N_LAYERS, 1, HIDDEN), jnp.float32),
        'ln2_b': jnp.zeros((N_LAYERS, 1, HIDDEN), jnp.float32),
        # pooler
        'pool_w': nrm(next(ks), (HIDDEN, HIDDEN)),
        'pool_b': jnp.zeros((1, HIDDEN), jnp.float32),
        # qa_classifier: Linear(H, H//2) -> ReLU -> Linear(H//2, 1)
        'qa_w1':  nrm(next(ks), (HIDDEN, HIDDEN // 2)),
        'qa_b1':  jnp.zeros((1, HIDDEN // 2), jnp.float32),
        'qa_w2t': nrm(next(ks), (1, HIDDEN // 2)),       # stored transposed ([out,in] row)
        'qa_b2':  jnp.zeros((1, 1), jnp.float32),
        # embedding_projection: Linear(H, H) -> Tanh
        'emb_w':  nrm(next(ks), (HIDDEN, HIDDEN)),
        'emb_b':  jnp.zeros((1, HIDDEN), jnp.float32),
    }
    return p


# ---------------- full forward ----------------
def enhanced_recipe_chatbot_forward(params, input_ids, attention_mask, token_type_ids=None):
    B, S = input_ids.shape
    if token_type_ids is None:
        token_type_ids = jnp.zeros_like(input_ids)

    ids2 = input_ids.reshape(B * S, 1).astype(jnp.int32)
    types2 = token_type_ids.reshape(B * S, 1).astype(jnp.int32)
    maskf = attention_mask.astype(jnp.float32)

    packed = _fused_call(params, ids2, types2, maskf, B)       # [B, 128] lane-dense

    qa_logits = packed[:, 0:1]
    embeddings = packed[:, 1:1 + HIDDEN]
    pooled_output = packed[:, 1 + HIDDEN:1 + 2 * HIDDEN]

    return {'qa_logits': qa_logits,
            'embeddings': embeddings,
            'pooled_output': pooled_output}


# ---------------- demo ----------------
if __name__ == "__main__":
    key = jax.random.PRNGKey(0)
    pk, ik = jax.random.split(key)

    B, S = 2, 8
    params = init_params(pk)
    input_ids = jax.random.randint(ik, (B, S), 0, VOCAB, dtype=jnp.int32)
    attention_mask = jnp.ones((B, S), jnp.int32).at[1, 6:].set(0)
    token_type_ids = jnp.zeros((B, S), jnp.int32)

    fwd = jax.jit(enhanced_recipe_chatbot_forward)
    out = fwd(params, input_ids, attention_mask, token_type_ids)
    jax.block_until_ready(out)

    assert out['qa_logits'].shape == (B, 1)
    assert out['embeddings'].shape == (B, HIDDEN)
    assert out['pooled_output'].shape == (B, HIDDEN)
    print("KERNEL_OK")
</pallas_src>

<mosaic_0001>
module attributes {stable_mosaic.version = 11 : i64} {
  func.func @fused_forward_kernel(%arg0: memref<16x1xi32, #tpu.memory_space<vmem>>, %arg1: memref<16x1xi32, #tpu.memory_space<vmem>>, %arg2: memref<2x8xf32, #tpu.memory_space<vmem>>, %arg3: memref<64x32xf32, #tpu.memory_space<vmem>>, %arg4: memref<16x32xf32, #tpu.memory_space<vmem>>, %arg5: memref<2x32xf32, #tpu.memory_space<vmem>>, %arg6: memref<1x32xf32, #tpu.memory_space<vmem>>, %arg7: memref<1x32xf32, #tpu.memory_space<vmem>>, %arg8: memref<2x32x96xf32, #tpu.memory_space<vmem>>, %arg9: memref<2x1x96xf32, #tpu.memory_space<vmem>>, %arg10: memref<2x32x32xf32, #tpu.memory_space<vmem>>, %arg11: memref<2x1x32xf32, #tpu.memory_space<vmem>>, %arg12: memref<2x1x32xf32, #tpu.memory_space<vmem>>, %arg13: memref<2x1x32xf32, #tpu.memory_space<vmem>>, %arg14: memref<2x32x64xf32, #tpu.memory_space<vmem>>, %arg15: memref<2x1x64xf32, #tpu.memory_space<vmem>>, %arg16: memref<2x64x32xf32, #tpu.memory_space<vmem>>, %arg17: memref<2x1x32xf32, #tpu.memory_space<vmem>>, %arg18: memref<2x1x32xf32, #tpu.memory_space<vmem>>, %arg19: memref<2x1x32xf32, #tpu.memory_space<vmem>>, %arg20: memref<32x32xf32, #tpu.memory_space<vmem>>, %arg21: memref<1x32xf32, #tpu.memory_space<vmem>>, %arg22: memref<32x16xf32, #tpu.memory_space<vmem>>, %arg23: memref<1x16xf32, #tpu.memory_space<vmem>>, %arg24: memref<1x16xf32, #tpu.memory_space<vmem>>, %arg25: memref<1x1xf32, #tpu.memory_space<vmem>>, %arg26: memref<32x32xf32, #tpu.memory_space<vmem>>, %arg27: memref<1x32xf32, #tpu.memory_space<vmem>>, %arg28: memref<2x128xf32, #tpu.memory_space<vmem>>) attributes {dimension_semantics = [], scalar_prefetch = 0 : i64, scratch_operands = 0 : i64, tpu.core_type = #tpu.core_type<tc>} {
    %c0 = arith.constant 0 : index
    %c0_0 = arith.constant 0 : index
    %0 = vector.load %arg0[%c0, %c0_0] : memref<16x1xi32, #tpu.memory_space<vmem>>, vector<16x1xi32>
    %1 = vector.shape_cast %0 : vector<16x1xi32> to vector<16x1xi32>
    %2 = vector.broadcast %1 : vector<16x1xi32> to vector<16x64xi32>
    %3 = tpu.iota {dimensions = array<i32: 1>} : vector<16x64xi32>
    %4 = arith.cmpi eq, %2, %3 : vector<16x64xi32>
    %5 = arith.extui %4 : vector<16x64xi1> to vector<16x64xi32>
    %6 = arith.sitofp %5 : vector<16x64xi32> to vector<16x64xf32>
    %c0_1 = arith.constant 0 : index
    %c0_2 = arith.constant 0 : index
    %7 = vector.load %arg3[%c0_1, %c0_2] : memref<64x32xf32, #tpu.memory_space<vmem>>, vector<64x32xf32>
    %cst = arith.constant dense<0.000000e+00> : vector<16x32xf32>
    %8 = tpu.matmul %6, %7, %cst {dimension_numbers = #tpu.dot_dimension_numbers<[1], [0], [0], [1], [0, 0, 1, 1], [], []>} : vector<16x64xf32>, vector<64x32xf32>, vector<16x32xf32> -> vector<16x32xf32>
    %c0_3 = arith.constant 0 : index
    %c0_4 = arith.constant 0 : index
    %9 = vector.load %arg5[%c0_3, %c0_4] : memref<2x32xf32, #tpu.memory_space<vmem>>, vector<2x32xf32>
    %c0_5 = arith.constant 0 : index
    %c0_6 = arith.constant 0 : index
    %10 = vector.load %arg1[%c0_5, %c0_6] : memref<16x1xi32, #tpu.memory_space<vmem>>, vector<16x1xi32>
    %c0_i32 = arith.constant 0 : i32
    %11 = vector.broadcast %c0_i32 : i32 to vector<16x1xi32>
    %12 = arith.cmpi eq, %10, %11 : vector<16x1xi32>
    %13 = vector.shape_cast %12 : vector<16x1xi1> to vector<16x1xi1>
    %14 = vector.broadcast %13 : vector<16x1xi1> to vector<16x32xi1>
    %15 = vector.extract_strided_slice %9 {offsets = [0, 0], sizes = [1, 32], strides = [1, 1]} : vector<2x32xf32> to vector<1x32xf32>
    %16 = vector.shape_cast %15 : vector<1x32xf32> to vector<1x32xf32>
    %17 = vector.broadcast %16 : vector<1x32xf32> to vector<16x32xf32>
    %18 = vector.extract_strided_slice %9 {offsets = [1, 0], sizes = [1, 32], strides = [1, 1]} : vector<2x32xf32> to vector<1x32xf32>
    %19 = vector.shape_cast %18 : vector<1x32xf32> to vector<1x32xf32>
    %20 = vector.broadcast %19 : vector<1x32xf32> to vector<16x32xf32>
    %21 = arith.select %14, %17, %20 : vector<16x32xi1>, vector<16x32xf32>
    %c0_7 = arith.constant 0 : index
    %c0_8 = arith.constant 0 : index
    %22 = vector.load %arg4[%c0_7, %c0_8] : memref<16x32xf32, #tpu.memory_space<vmem>>, vector<8x32xf32>
    %23 = tpu.concatenate %22, %22 in 0 : vector<8x32xf32>, vector<8x32xf32> -> vector<16x32xf32>
    %24 = arith.addf %8, %23 : vector<16x32xf32>
    %25 = arith.addf %24, %21 : vector<16x32xf32>
    %c0_9 = arith.constant 0 : index
    %c0_10 = arith.constant 0 : index
    %26 = vector.load %arg6[%c0_9, %c0_10] : memref<1x32xf32, #tpu.memory_space<vmem>>, vector<1x32xf32>
    %c0_11 = arith.constant 0 : index
    %c0_12 = arith.constant 0 : index
    %27 = vector.load %arg7[%c0_11, %c0_12] : memref<1x32xf32, #tpu.memory_space<vmem>>, vector<1x32xf32>
    %cst_13 = arith.constant dense<0.000000e+00> : vector<16xf32>
    %28 = vector.multi_reduction <add>, %25, %cst_13 [1] : vector<16x32xf32> to vector<16xf32>
    %29 = vector.shape_cast %28 : vector<16xf32> to vector<16x1xf32>
    %cst_14 = arith.constant 3.200000e+01 : f32
    %30 = vector.broadcast %cst_14 : f32 to vector<16x1xf32>
    %31 = arith.divf %29, %30 : vector<16x1xf32>
    %32 = vector.broadcast %31 : vector<16x1xf32> to vector<16x32xf32>
    %33 = arith.subf %25, %32 : vector<16x32xf32>
    %34 = arith.mulf %33, %33 : vector<16x32xf32>
    %cst_15 = arith.constant dense<0.000000e+00> : vector<16xf32>
    %35 = vector.multi_reduction <add>, %34, %cst_15 [1] : vector<16x32xf32> to vector<16xf32>
    %36 = vector.shape_cast %35 : vector<16xf32> to vector<16x1xf32>
    %cst_16 = arith.constant 3.200000e+01 : f32
    %37 = vector.broadcast %cst_16 : f32 to vector<16x1xf32>
    %38 = arith.divf %36, %37 : vector<16x1xf32>
    %39 = vector.broadcast %31 : vector<16x1xf32> to vector<16x32xf32>
    %40 = arith.subf %25, %39 : vector<16x32xf32>
    %cst_17 = arith.constant 9.99999996E-13 : f32
    %41 = vector.broadcast %cst_17 : f32 to vector<16x1xf32>
    %42 = arith.addf %38, %41 : vector<16x1xf32>
    %43 = math.rsqrt %42 : vector<16x1xf32>
    %44 = vector.broadcast %43 : vector<16x1xf32> to vector<16x32xf32>
    %45 = arith.mulf %40, %44 : vector<16x32xf32>
    %46 = vector.broadcast %26 : vector<1x32xf32> to vector<16x32xf32>
    %47 = arith.mulf %45, %46 : vector<16x32xf32>
    %48 = vector.broadcast %27 : vector<1x32xf32> to vector<16x32xf32>
    %49 = arith.addf %47, %48 : vector<16x32xf32>
    %c0_18 = arith.constant 0 : index
    %c0_19 = arith.constant 0 : index
    %50 = vector.load %arg2[%c0_18, %c0_19] : memref<2x8xf32, #tpu.memory_space<vmem>>, vector<2x8xf32>
    %cst_20 = arith.constant 1.000000e+00 : f32
    %51 = vector.broadcast %cst_20 : f32 to vector<2x8xf32>
    %52 = arith.subf %51, %50 : vector<2x8xf32>
    %cst_21 = arith.constant -1.000000e+09 : f32
    %53 = vector.broadcast %cst_21 : f32 to vector<2x8xf32>
    %54 = arith.mulf %52, %53 : vector<2x8xf32>
    %55 = vector.shape_cast %54 : vector<2x8xf32> to vector<2x1x8xf32>
    %56 = vector.shape_cast %55 : vector<2x1x8xf32> to vector<2x1x8xf32>
    %57 = vector.broadcast %56 : vector<2x1x8xf32> to vector<2x8x8xf32>
    %c0_22 = arith.constant 0 : index
    %c0_23 = arith.constant 0 : index
    %c0_24 = arith.constant 0 : index
    %58 = vector.load %arg8[%c0_22, %c0_23, %c0_24] : memref<2x32x96xf32, #tpu.memory_space<vmem>>, vector<1x32x96xf32>
    %59 = vector.shape_cast %58 : vector<1x32x96xf32> to vector<32x96xf32>
    %cst_25 = arith.constant dense<0.000000e+00> : vector<16x96xf32>
    %60 = tpu.matmul %49, %59, %cst_25 {dimension_numbers = #tpu.dot_dimension_numbers<[1], [0], [0], [1], [0, 0, 1, 1], [], []>} : vector<16x32xf32>, vector<32x96xf32>, vector<16x96xf32> -> vector<16x96xf32>
    %c0_26 = arith.constant 0 : index
    %c0_27 = arith.constant 0 : index
    %c0_28 = arith.constant 0 : index
    %61 = vector.load %arg9[%c0_26, %c0_27, %c0_28] : memref<2x1x96xf32, #tpu.memory_space<vmem>>, vector<1x1x96xf32>
    %62 = vector.shape_cast %61 : vector<1x1x96xf32> to vector<1x96xf32>
    %63 = vector.broadcast %62 : vector<1x96xf32> to vector<16x96xf32>
    %64 = arith.addf %60, %63 : vector<16x96xf32>
    %65 = vector.extract_strided_slice %64 {offsets = [0, 0], sizes = [16, 32], strides = [1, 1]} : vector<16x96xf32> to vector<16x32xf32>
    %66 = vector.shape_cast %65 : vector<16x32xf32> to vector<2x8x32xf32>
    %67 = vector.extract_strided_slice %64 {offsets = [0, 32], sizes = [16, 32], strides = [1, 1]} : vector<16x96xf32> to vector<16x32xf32>
    %68 = vector.shape_cast %67 : vector<16x32xf32> to vector<2x8x32xf32>
    %69 = vector.extract_strided_slice %64 {offsets = [0, 64], sizes = [16, 32], strides = [1, 1]} : vector<16x96xf32> to vector<16x32xf32>
    %70 = vector.shape_cast %69 : vector<16x32xf32> to vector<2x8x32xf32>
    %71 = vector.extract_strided_slice %66 {offsets = [0, 0, 0], sizes = [2, 8, 16], strides = [1, 1, 1]} : vector<2x8x32xf32> to vector<2x8x16xf32>
    %72 = vector.extract_strided_slice %68 {offsets = [0, 0, 0], sizes = [2, 8, 16], strides = [1, 1, 1]} : vector<2x8x32xf32> to vector<2x8x16xf32>
    %73 = vector.extract_strided_slice %70 {offsets = [0, 0, 0], sizes = [2, 8, 16], strides = [1, 1, 1]} : vector<2x8x32xf32> to vector<2x8x16xf32>
    "tpu.trace_start"() <{level = 10 : i32, message = "bqd,bkd->bqk"}> : () -> ()
    %cst_29 = arith.constant dense<0.000000e+00> : vector<2x8x8xf32>
    %74 = tpu.matmul %71, %72, %cst_29 {dimension_numbers = #tpu.dot_dimension_numbers<[2], [2], [1], [1], [0, 0, 0, 1, 1, 1], [0], [0]>} : vector<2x8x16xf32>, vector<2x8x16xf32>, vector<2x8x8xf32> -> vector<2x8x8xf32>
    "tpu.trace_stop"() : () -> ()
    %cst_30 = arith.constant 2.500000e-01 : f32
    %75 = vector.broadcast %cst_30 : f32 to vector<2x8x8xf32>
    %76 = arith.mulf %74, %75 : vector<2x8x8xf32>
    %77 = arith.addf %76, %57 : vector<2x8x8xf32>
    %cst_31 = arith.constant dense<0xFF800000> : vector<2x8xf32>
    %78 = vector.multi_reduction <maximumf>, %77, %cst_31 [2] : vector<2x8x8xf32> to vector<2x8xf32>
    %79 = vector.shape_cast %78 : vector<2x8xf32> to vector<2x8x1xf32>
    %80 = vector.broadcast %79 : vector<2x8x1xf32> to vector<2x8x8xf32>
    %81 = arith.subf %77, %80 : vector<2x8x8xf32>
    %82 = math.exp %81 : vector<2x8x8xf32>
    %cst_32 = arith.constant dense<0.000000e+00> : vector<2x8xf32>
    %83 = vector.multi_reduction <add>, %82, %cst_32 [2] : vector<2x8x8xf32> to vector<2x8xf32>
    %84 = vector.shape_cast %83 : vector<2x8xf32> to vector<2x8x1xf32>
    %85 = tpu.reciprocal %84 {approx = true} : vector<2x8x1xf32> -> vector<2x8x1xf32>
    %86 = vector.broadcast %85 : vector<2x8x1xf32> to vector<2x8x8xf32>
    %87 = arith.mulf %82, %86 : vector<2x8x8xf32>
    "tpu.trace_start"() <{level = 10 : i32, message = "bqk,bkd->bqd"}> : () -> ()
    %cst_33 = arith.constant dense<0.000000e+00> : vector<2x8x16xf32>
    %88 = tpu.matmul %87, %73, %cst_33 {dimension_numbers = #tpu.dot_dimension_numbers<[2], [1], [1], [2], [0, 0, 0, 1, 1, 2], [0], [0]>} : vector<2x8x8xf32>, vector<2x8x16xf32>, vector<2x8x16xf32> -> vector<2x8x16xf32>
    "tpu.trace_stop"() : () -> ()
    %89 = vector.extract_strided_slice %66 {offsets = [0, 0, 16], sizes = [2, 8, 16], strides = [1, 1, 1]} : vector<2x8x32xf32> to vector<2x8x16xf32>
    %90 = vector.extract_strided_slice %68 {offsets = [0, 0, 16], sizes = [2, 8, 16], strides = [1, 1, 1]} : vector<2x8x32xf32> to vector<2x8x16xf32>
    %91 = vector.extract_strided_slice %70 {offsets = [0, 0, 16], sizes = [2, 8, 16], strides = [1, 1, 1]} : vector<2x8x32xf32> to vector<2x8x16xf32>
    "tpu.trace_start"() <{level = 10 : i32, message = "bqd,bkd->bqk"}> : () -> ()
    %cst_34 = arith.constant dense<0.000000e+00> : vector<2x8x8xf32>
    %92 = tpu.matmul %89, %90, %cst_34 {dimension_numbers = #tpu.dot_dimension_numbers<[2], [2], [1], [1], [0, 0, 0, 1, 1, 1], [0], [0]>} : vector<2x8x16xf32>, vector<2x8x16xf32>, vector<2x8x8xf32> -> vector<2x8x8xf32>
    "tpu.trace_stop"() : () -> ()
    %cst_35 = arith.constant 2.500000e-01 : f32
    %93 = vector.broadcast %cst_35 : f32 to vector<2x8x8xf32>
    %94 = arith.mulf %92, %93 : vector<2x8x8xf32>
    %95 = arith.addf %94, %57 : vector<2x8x8xf32>
    %cst_36 = arith.constant dense<0xFF800000> : vector<2x8xf32>
    %96 = vector.multi_reduction <maximumf>, %95, %cst_36 [2] : vector<2x8x8xf32> to vector<2x8xf32>
    %97 = vector.shape_cast %96 : vector<2x8xf32> to vector<2x8x1xf32>
    %98 = vector.broadcast %97 : vector<2x8x1xf32> to vector<2x8x8xf32>
    %99 = arith.subf %95, %98 : vector<2x8x8xf32>
    %100 = math.exp %99 : vector<2x8x8xf32>
    %cst_37 = arith.constant dense<0.000000e+00> : vector<2x8xf32>
    %101 = vector.multi_reduction <add>, %100, %cst_37 [2] : vector<2x8x8xf32> to vector<2x8xf32>
    %102 = vector.shape_cast %101 : vector<2x8xf32> to vector<2x8x1xf32>
    %103 = tpu.reciprocal %102 {approx = true} : vector<2x8x1xf32> -> vector<2x8x1xf32>
    %104 = vector.broadcast %103 : vector<2x8x1xf32> to vector<2x8x8xf32>
    %105 = arith.mulf %100, %104 : vector<2x8x8xf32>
    "tpu.trace_start"() <{level = 10 : i32, message = "bqk,bkd->bqd"}> : () -> ()
    %cst_38 = arith.constant dense<0.000000e+00> : vector<2x8x16xf32>
    %106 = tpu.matmul %105, %91, %cst_38 {dimension_numbers = #tpu.dot_dimension_numbers<[2], [1], [1], [2], [0, 0, 0, 1, 1, 2], [0], [0]>} : vector<2x8x8xf32>, vector<2x8x16xf32>, vector<2x8x16xf32> -> vector<2x8x16xf32>
    "tpu.trace_stop"() : () -> ()
    %107 = tpu.concatenate %88, %106 in 2 : vector<2x8x16xf32>, vector<2x8x16xf32> -> vector<2x8x32xf32>
    %108 = vector.shape_cast %107 : vector<2x8x32xf32> to vector<16x32xf32>
    %c0_39 = arith.constant 0 : index
    %c0_40 = arith.constant 0 : index
    %c0_41 = arith.constant 0 : index
    %109 = vector.load %arg10[%c0_39, %c0_40, %c0_41] : memref<2x32x32xf32, #tpu.memory_space<vmem>>, vector<1x32x32xf32>
    %110 = vector.shape_cast %109 : vector<1x32x32xf32> to vector<32x32xf32>
    %cst_42 = arith.constant dense<0.000000e+00> : vector<16x32xf32>
    %111 = tpu.matmul %108, %110, %cst_42 {dimension_numbers = #tpu.dot_dimension_numbers<[1], [0], [0], [1], [0, 0, 1, 1], [], []>} : vector<16x32xf32>, vector<32x32xf32>, vector<16x32xf32> -> vector<16x32xf32>
    %c0_43 = arith.constant 0 : index
    %c0_44 = arith.constant 0 : index
    %c0_45 = arith.constant 0 : index
    %112 = vector.load %arg11[%c0_43, %c0_44, %c0_45] : memref<2x1x32xf32, #tpu.memory_space<vmem>>, vector<1x1x32xf32>
    %113 = vector.shape_cast %112 : vector<1x1x32xf32> to vector<1x32xf32>
    %114 = vector.broadcast %113 : vector<1x32xf32> to vector<16x32xf32>
    %115 = arith.addf %111, %114 : vector<16x32xf32>
    %116 = arith.addf %49, %115 : vector<16x32xf32>
    %c0_46 = arith.constant 0 : index
    %c0_47 = arith.constant 0 : index
    %c0_48 = arith.constant 0 : index
    %117 = vector.load %arg12[%c0_46, %c0_47, %c0_48] : memref<2x1x32xf32, #tpu.memory_space<vmem>>, vector<1x1x32xf32>
    %118 = vector.shape_cast %117 : vector<1x1x32xf32> to vector<1x32xf32>
    %c0_49 = arith.constant 0 : index
    %c0_50 = arith.constant 0 : index
    %c0_51 = arith.constant 0 : index
    %119 = vector.load %arg13[%c0_49, %c0_50, %c0_51] : memref<2x1x32xf32, #tpu.memory_space<vmem>>, vector<1x1x32xf32>
    %120 = vector.shape_cast %119 : vector<1x1x32xf32> to vector<1x32xf32>
    %cst_52 = arith.constant dense<0.000000e+00> : vector<16xf32>
    %121 = vector.multi_reduction <add>, %116, %cst_52 [1] : vector<16x32xf32> to vector<16xf32>
    %122 = vector.shape_cast %121 : vector<16xf32> to vector<16x1xf32>
    %cst_53 = arith.constant 3.200000e+01 : f32
    %123 = vector.broadcast %cst_53 : f32 to vector<16x1xf32>
    %124 = arith.divf %122, %123 : vector<16x1xf32>
    %125 = vector.broadcast %124 : vector<16x1xf32> to vector<16x32xf32>
    %126 = arith.subf %116, %125 : vector<16x32xf32>
    %127 = arith.mulf %126, %126 : vector<16x32xf32>
    %cst_54 = arith.constant dense<0.000000e+00> : vector<16xf32>
    %128 = vector.multi_reduction <add>, %127, %cst_54 [1] : vector<16x32xf32> to vector<16xf32>
    %129 = vector.shape_cast %128 : vector<16xf32> to vector<16x1xf32>
    %cst_55 = arith.constant 3.200000e+01 : f32
    %130 = vector.broadcast %cst_55 : f32 to vector<16x1xf32>
    %131 = arith.divf %129, %130 : vector<16x1xf32>
    %132 = vector.broadcast %124 : vector<16x1xf32> to vector<16x32xf32>
    %133 = arith.subf %116, %132 : vector<16x32xf32>
    %cst_56 = arith.constant 9.99999996E-13 : f32
    %134 = vector.broadcast %cst_56 : f32 to vector<16x1xf32>
    %135 = arith.addf %131, %134 : vector<16x1xf32>
    %136 = math.rsqrt %135 : vector<16x1xf32>
    %137 = vector.broadcast %136 : vector<16x1xf32> to vector<16x32xf32>
    %138 = arith.mulf %133, %137 : vector<16x32xf32>
    %139 = vector.broadcast %118 : vector<1x32xf32> to vector<16x32xf32>
    %140 = arith.mulf %138, %139 : vector<16x32xf32>
    %141 = vector.broadcast %120 : vector<1x32xf32> to vector<16x32xf32>
    %142 = arith.addf %140, %141 : vector<16x32xf32>
    %c0_57 = arith.constant 0 : index
    %c0_58 = arith.constant 0 : index
    %c0_59 = arith.constant 0 : index
    %143 = vector.load %arg14[%c0_57, %c0_58, %c0_59] : memref<2x32x64xf32, #tpu.memory_space<vmem>>, vector<1x32x64xf32>
    %144 = vector.shape_cast %143 : vector<1x32x64xf32> to vector<32x64xf32>
    %cst_60 = arith.constant dense<0.000000e+00> : vector<16x64xf32>
    %145 = tpu.matmul %142, %144, %cst_60 {dimension_numbers = #tpu.dot_dimension_numbers<[1], [0], [0], [1], [0, 0, 1, 1], [], []>} : vector<16x32xf32>, vector<32x64xf32>, vector<16x64xf32> -> vector<16x64xf32>
    %c0_61 = arith.constant 0 : index
    %c0_62 = arith.constant 0 : index
    %c0_63 = arith.constant 0 : index
    %146 = vector.load %arg15[%c0_61, %c0_62, %c0_63] : memref<2x1x64xf32, #tpu.memory_space<vmem>>, vector<1x1x64xf32>
    %147 = vector.shape_cast %146 : vector<1x1x64xf32> to vector<1x64xf32>
    %148 = vector.broadcast %147 : vector<1x64xf32> to vector<16x64xf32>
    %149 = arith.addf %145, %148 : vector<16x64xf32>
    %cst_64 = arith.constant 5.000000e-01 : f32
    %150 = vector.broadcast %cst_64 : f32 to vector<16x64xf32>
    %151 = arith.mulf %150, %149 : vector<16x64xf32>
    %cst_65 = arith.constant 4.471500e-02 : f32
    %152 = vector.broadcast %cst_65 : f32 to vector<16x64xf32>
    %153 = arith.mulf %152, %149 : vector<16x64xf32>
    %154 = arith.mulf %153, %149 : vector<16x64xf32>
    %155 = arith.mulf %154, %149 : vector<16x64xf32>
    %156 = arith.addf %149, %155 : vector<16x64xf32>
    %cst_66 = arith.constant 0.797884583 : f32
    %157 = vector.broadcast %cst_66 : f32 to vector<16x64xf32>
    %158 = arith.mulf %157, %156 : vector<16x64xf32>
    %159 = math.tanh %158 : vector<16x64xf32>
    %cst_67 = arith.constant 1.000000e+00 : f32
    %160 = vector.broadcast %cst_67 : f32 to vector<16x64xf32>
    %161 = arith.addf %160, %159 : vector<16x64xf32>
    %162 = arith.mulf %151, %161 : vector<16x64xf32>
    %c0_68 = arith.constant 0 : index
    %c0_69 = arith.constant 0 : index
    %c0_70 = arith.constant 0 : index
    %163 = vector.load %arg16[%c0_68, %c0_69, %c0_70] : memref<2x64x32xf32, #tpu.memory_space<vmem>>, vector<1x64x32xf32>
    %164 = vector.shape_cast %163 : vector<1x64x32xf32> to vector<64x32xf32>
    %cst_71 = arith.constant dense<0.000000e+00> : vector<16x32xf32>
    %165 = tpu.matmul %162, %164, %cst_71 {dimension_numbers = #tpu.dot_dimension_numbers<[1], [0], [0], [1], [0, 0, 1, 1], [], []>} : vector<16x64xf32>, vector<64x32xf32>, vector<16x32xf32> -> vector<16x32xf32>
    %c0_72 = arith.constant 0 : index
    %c0_73 = arith.constant 0 : index
    %c0_74 = arith.constant 0 : index
    %166 = vector.load %arg17[%c0_72, %c0_73, %c0_74] : memref<2x1x32xf32, #tpu.memory_space<vmem>>, vector<1x1x32xf32>
    %167 = vector.shape_cast %166 : vector<1x1x32xf32> to vector<1x32xf32>
    %168 = vector.broadcast %167 : vector<1x32xf32> to vector<16x32xf32>
    %169 = arith.addf %165, %168 : vector<16x32xf32>
    %170 = arith.addf %142, %169 : vector<16x32xf32>
    %c0_75 = arith.constant 0 : index
    %c0_76 = arith.constant 0 : index
    %c0_77 = arith.constant 0 : index
    %171 = vector.load %arg18[%c0_75, %c0_76, %c0_77] : memref<2x1x32xf32, #tpu.memory_space<vmem>>, vector<1x1x32xf32>
    %172 = vector.shape_cast %171 : vector<1x1x32xf32> to vector<1x32xf32>
    %c0_78 = arith.constant 0 : index
    %c0_79 = arith.constant 0 : index
    %c0_80 = arith.constant 0 : index
    %173 = vector.load %arg19[%c0_78, %c0_79, %c0_80] : memref<2x1x32xf32, #tpu.memory_space<vmem>>, vector<1x1x32xf32>
    %174 = vector.shape_cast %173 : vector<1x1x32xf32> to vector<1x32xf32>
    %cst_81 = arith.constant dense<0.000000e+00> : vector<16xf32>
    %175 = vector.multi_reduction <add>, %170, %cst_81 [1] : vector<16x32xf32> to vector<16xf32>
    %176 = vector.shape_cast %175 : vector<16xf32> to vector<16x1xf32>
    %cst_82 = arith.constant 3.200000e+01 : f32
    %177 = vector.broadcast %cst_82 : f32 to vector<16x1xf32>
    %178 = arith.divf %176, %177 : vector<16x1xf32>
    %179 = vector.broadcast %178 : vector<16x1xf32> to vector<16x32xf32>
    %180 = arith.subf %170, %179 : vector<16x32xf32>
    %181 = arith.mulf %180, %180 : vector<16x32xf32>
    %cst_83 = arith.constant dense<0.000000e+00> : vector<16xf32>
    %182 = vector.multi_reduction <add>, %181, %cst_83 [1] : vector<16x32xf32> to vector<16xf32>
    %183 = vector.shape_cast %182 : vector<16xf32> to vector<16x1xf32>
    %cst_84 = arith.constant 3.200000e+01 : f32
    %184 = vector.broadcast %cst_84 : f32 to vector<16x1xf32>
    %185 = arith.divf %183, %184 : vector<16x1xf32>
    %186 = vector.broadcast %178 : vector<16x1xf32> to vector<16x32xf32>
    %187 = arith.subf %170, %186 : vector<16x32xf32>
    %cst_85 = arith.constant 9.99999996E-13 : f32
    %188 = vector.broadcast %cst_85 : f32 to vector<16x1xf32>
    %189 = arith.addf %185, %188 : vector<16x1xf32>
    %190 = math.rsqrt %189 : vector<16x1xf32>
    %191 = vector.broadcast %190 : vector<16x1xf32> to vector<16x32xf32>
    %192 = arith.mulf %187, %191 : vector<16x32xf32>
    %193 = vector.broadcast %172 : vector<1x32xf32> to vector<16x32xf32>
    %194 = arith.mulf %192, %193 : vector<16x32xf32>
    %195 = vector.broadcast %174 : vector<1x32xf32> to vector<16x32xf32>
    %196 = arith.addf %194, %195 : vector<16x32xf32>
    %c1 = arith.constant 1 : index
    %c0_86 = arith.constant 0 : index
    %c0_87 = arith.constant 0 : index
    %197 = vector.load %arg8[%c1, %c0_86, %c0_87] : memref<2x32x96xf32, #tpu.memory_space<vmem>>, vector<1x32x96xf32>
    %198 = vector.shape_cast %197 : vector<1x32x96xf32> to vector<32x96xf32>
    %cst_88 = arith.constant dense<0.000000e+00> : vector<16x96xf32>
    %199 = tpu.matmul %196, %198, %cst_88 {dimension_numbers = #tpu.dot_dimension_numbers<[1], [0], [0], [1], [0, 0, 1, 1], [], []>} : vector<16x32xf32>, vector<32x96xf32>, vector<16x96xf32> -> vector<16x96xf32>
    %c1_89 = arith.constant 1 : index
    %c0_90 = arith.constant 0 : index
    %c0_91 = arith.constant 0 : index
    %200 = vector.load %arg9[%c1_89, %c0_90, %c0_91] : memref<2x1x96xf32, #tpu.memory_space<vmem>>, vector<1x1x96xf32>
    %201 = vector.shape_cast %200 : vector<1x1x96xf32> to vector<1x96xf32>
    %202 = vector.broadcast %201 : vector<1x96xf32> to vector<16x96xf32>
    %203 = arith.addf %199, %202 : vector<16x96xf32>
    %204 = vector.extract_strided_slice %203 {offsets = [0, 0], sizes = [16, 32], strides = [1, 1]} : vector<16x96xf32> to vector<16x32xf32>
    %205 = vector.shape_cast %204 : vector<16x32xf32> to vector<2x8x32xf32>
    %206 = vector.extract_strided_slice %203 {offsets = [0, 32], sizes = [16, 32], strides = [1, 1]} : vector<16x96xf32> to vector<16x32xf32>
    %207 = vector.shape_cast %206 : vector<16x32xf32> to vector<2x8x32xf32>
    %208 = vector.extract_strided_slice %203 {offsets = [0, 64], sizes = [16, 32], strides = [1, 1]} : vector<16x96xf32> to vector<16x32xf32>
    %209 = vector.shape_cast %208 : vector<16x32xf32> to vector<2x8x32xf32>
    %210 = vector.extract_strided_slice %205 {offsets = [0, 0, 0], sizes = [2, 8, 16], strides = [1, 1, 1]} : vector<2x8x32xf32> to vector<2x8x16xf32>
    %211 = vector.extract_strided_slice %207 {offsets = [0, 0, 0], sizes = [2, 8, 16], strides = [1, 1, 1]} : vector<2x8x32xf32> to vector<2x8x16xf32>
    %212 = vector.extract_strided_slice %209 {offsets = [0, 0, 0], sizes = [2, 8, 16], strides = [1, 1, 1]} : vector<2x8x32xf32> to vector<2x8x16xf32>
    "tpu.trace_start"() <{level = 10 : i32, message = "bqd,bkd->bqk"}> : () -> ()
    %cst_92 = arith.constant dense<0.000000e+00> : vector<2x8x8xf32>
    %213 = tpu.matmul %210, %211, %cst_92 {dimension_numbers = #tpu.dot_dimension_numbers<[2], [2], [1], [1], [0, 0, 0, 1, 1, 1], [0], [0]>} : vector<2x8x16xf32>, vector<2x8x16xf32>, vector<2x8x8xf32> -> vector<2x8x8xf32>
    "tpu.trace_stop"() : () -> ()
    %cst_93 = arith.constant 2.500000e-01 : f32
    %214 = vector.broadcast %cst_93 : f32 to vector<2x8x8xf32>
    %215 = arith.mulf %213, %214 : vector<2x8x8xf32>
    %216 = arith.addf %215, %57 : vector<2x8x8xf32>
    %cst_94 = arith.constant dense<0xFF800000> : vector<2x8xf32>
    %217 = vector.multi_reduction <maximumf>, %216, %cst_94 [2] : vector<2x8x8xf32> to vector<2x8xf32>
    %218 = vector.shape_cast %217 : vector<2x8xf32> to vector<2x8x1xf32>
    %219 = vector.broadcast %218 : vector<2x8x1xf32> to vector<2x8x8xf32>
    %220 = arith.subf %216, %219 : vector<2x8x8xf32>
    %221 = math.exp %220 : vector<2x8x8xf32>
    %cst_95 = arith.constant dense<0.000000e+00> : vector<2x8xf32>
    %222 = vector.multi_reduction <add>, %221, %cst_95 [2] : vector<2x8x8xf32> to vector<2x8xf32>
    %223 = vector.shape_cast %222 : vector<2x8xf32> to vector<2x8x1xf32>
    %224 = tpu.reciprocal %223 {approx = true} : vector<2x8x1xf32> -> vector<2x8x1xf32>
    %225 = vector.broadcast %224 : vector<2x8x1xf32> to vector<2x8x8xf32>
    %226 = arith.mulf %221, %225 : vector<2x8x8xf32>
    "tpu.trace_start"() <{level = 10 : i32, message = "bqk,bkd->bqd"}> : () -> ()
    %cst_96 = arith.constant dense<0.000000e+00> : vector<2x8x16xf32>
    %227 = tpu.matmul %226, %212, %cst_96 {dimension_numbers = #tpu.dot_dimension_numbers<[2], [1], [1], [2], [0, 0, 0, 1, 1, 2], [0], [0]>} : vector<2x8x8xf32>, vector<2x8x16xf32>, vector<2x8x16xf32> -> vector<2x8x16xf32>
    "tpu.trace_stop"() : () -> ()
    %228 = vector.extract_strided_slice %205 {offsets = [0, 0, 16], sizes = [2, 8, 16], strides = [1, 1, 1]} : vector<2x8x32xf32> to vector<2x8x16xf32>
    %229 = vector.extract_strided_slice %207 {offsets = [0, 0, 16], sizes = [2, 8, 16], strides = [1, 1, 1]} : vector<2x8x32xf32> to vector<2x8x16xf32>
    %230 = vector.extract_strided_slice %209 {offsets = [0, 0, 16], sizes = [2, 8, 16], strides = [1, 1, 1]} : vector<2x8x32xf32> to vector<2x8x16xf32>
    "tpu.trace_start"() <{level = 10 : i32, message = "bqd,bkd->bqk"}> : () -> ()
    %cst_97 = arith.constant dense<0.000000e+00> : vector<2x8x8xf32>
    %231 = tpu.matmul %228, %229, %cst_97 {dimension_numbers = #tpu.dot_dimension_numbers<[2], [2], [1], [1], [0, 0, 0, 1, 1, 1], [0], [0]>} : vector<2x8x16xf32>, vector<2x8x16xf32>, vector<2x8x8xf32> -> vector<2x8x8xf32>
    "tpu.trace_stop"() : () -> ()
    %cst_98 = arith.constant 2.500000e-01 : f32
    %232 = vector.broadcast %cst_98 : f32 to vector<2x8x8xf32>
    %233 = arith.mulf %231, %232 : vector<2x8x8xf32>
    %234 = arith.addf %233, %57 : vector<2x8x8xf32>
    %cst_99 = arith.constant dense<0xFF800000> : vector<2x8xf32>
    %235 = vector.multi_reduction <maximumf>, %234, %cst_99 [2] : vector<2x8x8xf32> to vector<2x8xf32>
    %236 = vector.shape_cast %235 : vector<2x8xf32> to vector<2x8x1xf32>
    %237 = vector.broadcast %236 : vector<2x8x1xf32> to vector<2x8x8xf32>
    %238 = arith.subf %234, %237 : vector<2x8x8xf32>
    %239 = math.exp %238 : vector<2x8x8xf32>
    %cst_100 = arith.constant dense<0.000000e+00> : vector<2x8xf32>
    %240 = vector.multi_reduction <add>, %239, %cst_100 [2] : vector<2x8x8xf32> to vector<2x8xf32>
    %241 = vector.shape_cast %240 : vector<2x8xf32> to vector<2x8x1xf32>
    %242 = tpu.reciprocal %241 {approx = true} : vector<2x8x1xf32> -> vector<2x8x1xf32>
    %243 = vector.broadcast %242 : vector<2x8x1xf32> to vector<2x8x8xf32>
    %244 = arith.mulf %239, %243 : vector<2x8x8xf32>
    "tpu.trace_start"() <{level = 10 : i32, message = "bqk,bkd->bqd"}> : () -> ()
    %cst_101 = arith.constant dense<0.000000e+00> : vector<2x8x16xf32>
    %245 = tpu.matmul %244, %230, %cst_101 {dimension_numbers = #tpu.dot_dimension_numbers<[2], [1], [1], [2], [0, 0, 0, 1, 1, 2], [0], [0]>} : vector<2x8x8xf32>, vector<2x8x16xf32>, vector<2x8x16xf32> -> vector<2x8x16xf32>
    "tpu.trace_stop"() : () -> ()
    %246 = tpu.concatenate %227, %245 in 2 : vector<2x8x16xf32>, vector<2x8x16xf32> -> vector<2x8x32xf32>
    %247 = vector.shape_cast %246 : vector<2x8x32xf32> to vector<16x32xf32>
    %c1_102 = arith.constant 1 : index
    %c0_103 = arith.constant 0 : index
    %c0_104 = arith.constant 0 : index
    %248 = vector.load %arg10[%c1_102, %c0_103, %c0_104] : memref<2x32x32xf32, #tpu.memory_space<vmem>>, vector<1x32x32xf32>
    %249 = vector.shape_cast %248 : vector<1x32x32xf32> to vector<32x32xf32>
    %cst_105 = arith.constant dense<0.000000e+00> : vector<16x32xf32>
    %250 = tpu.matmul %247, %249, %cst_105 {dimension_numbers = #tpu.dot_dimension_numbers<[1], [0], [0], [1], [0, 0, 1, 1], [], []>} : vector<16x32xf32>, vector<32x32xf32>, vector<16x32xf32> -> vector<16x32xf32>
    %c1_106 = arith.constant 1 : index
    %c0_107 = arith.constant 0 : index
    %c0_108 = arith.constant 0 : index
    %251 = vector.load %arg11[%c1_106, %c0_107, %c0_108] : memref<2x1x32xf32, #tpu.memory_space<vmem>>, vector<1x1x32xf32>
    %252 = vector.shape_cast %251 : vector<1x1x32xf32> to vector<1x32xf32>
    %253 = vector.broadcast %252 : vector<1x32xf32> to vector<16x32xf32>
    %254 = arith.addf %250, %253 : vector<16x32xf32>
    %255 = arith.addf %196, %254 : vector<16x32xf32>
    %c1_109 = arith.constant 1 : index
    %c0_110 = arith.constant 0 : index
    %c0_111 = arith.constant 0 : index
    %256 = vector.load %arg12[%c1_109, %c0_110, %c0_111] : memref<2x1x32xf32, #tpu.memory_space<vmem>>, vector<1x1x32xf32>
    %257 = vector.shape_cast %256 : vector<1x1x32xf32> to vector<1x32xf32>
    %c1_112 = arith.constant 1 : index
    %c0_113 = arith.constant 0 : index
    %c0_114 = arith.constant 0 : index
    %258 = vector.load %arg13[%c1_112, %c0_113, %c0_114] : memref<2x1x32xf32, #tpu.memory_space<vmem>>, vector<1x1x32xf32>
    %259 = vector.shape_cast %258 : vector<1x1x32xf32> to vector<1x32xf32>
    %cst_115 = arith.constant dense<0.000000e+00> : vector<16xf32>
    %260 = vector.multi_reduction <add>, %255, %cst_115 [1] : vector<16x32xf32> to vector<16xf32>
    %261 = vector.shape_cast %260 : vector<16xf32> to vector<16x1xf32>
    %cst_116 = arith.constant 3.200000e+01 : f32
    %262 = vector.broadcast %cst_116 : f32 to vector<16x1xf32>
    %263 = arith.divf %261, %262 : vector<16x1xf32>
    %264 = vector.broadcast %263 : vector<16x1xf32> to vector<16x32xf32>
    %265 = arith.subf %255, %264 : vector<16x32xf32>
    %266 = arith.mulf %265, %265 : vector<16x32xf32>
    %cst_117 = arith.constant dense<0.000000e+00> : vector<16xf32>
    %267 = vector.multi_reduction <add>, %266, %cst_117 [1] : vector<16x32xf32> to vector<16xf32>
    %268 = vector.shape_cast %267 : vector<16xf32> to vector<16x1xf32>
    %cst_118 = arith.constant 3.200000e+01 : f32
    %269 = vector.broadcast %cst_118 : f32 to vector<16x1xf32>
    %270 = arith.divf %268, %269 : vector<16x1xf32>
    %271 = vector.broadcast %263 : vector<16x1xf32> to vector<16x32xf32>
    %272 = arith.subf %255, %271 : vector<16x32xf32>
    %cst_119 = arith.constant 9.99999996E-13 : f32
    %273 = vector.broadcast %cst_119 : f32 to vector<16x1xf32>
    %274 = arith.addf %270, %273 : vector<16x1xf32>
    %275 = math.rsqrt %274 : vector<16x1xf32>
    %276 = vector.broadcast %275 : vector<16x1xf32> to vector<16x32xf32>
    %277 = arith.mulf %272, %276 : vector<16x32xf32>
    %278 = vector.broadcast %257 : vector<1x32xf32> to vector<16x32xf32>
    %279 = arith.mulf %277, %278 : vector<16x32xf32>
    %280 = vector.broadcast %259 : vector<1x32xf32> to vector<16x32xf32>
    %281 = arith.addf %279, %280 : vector<16x32xf32>
    %c1_120 = arith.constant 1 : index
    %c0_121 = arith.constant 0 : index
    %c0_122 = arith.constant 0 : index
    %282 = vector.load %arg14[%c1_120, %c0_121, %c0_122] : memref<2x32x64xf32, #tpu.memory_space<vmem>>, vector<1x32x64xf32>
    %283 = vector.shape_cast %282 : vector<1x32x64xf32> to vector<32x64xf32>
    %cst_123 = arith.constant dense<0.000000e+00> : vector<16x64xf32>
    %284 = tpu.matmul %281, %283, %cst_123 {dimension_numbers = #tpu.dot_dimension_numbers<[1], [0], [0], [1], [0, 0, 1, 1], [], []>} : vector<16x32xf32>, vector<32x64xf32>, vector<16x64xf32> -> vector<16x64xf32>
    %c1_124 = arith.constant 1 : index
    %c0_125 = arith.constant 0 : index
    %c0_126 = arith.constant 0 : index
    %285 = vector.load %arg15[%c1_124, %c0_125, %c0_126] : memref<2x1x64xf32, #tpu.memory_space<vmem>>, vector<1x1x64xf32>
    %286 = vector.shape_cast %285 : vector<1x1x64xf32> to vector<1x64xf32>
    %287 = vector.broadcast %286 : vector<1x64xf32> to vector<16x64xf32>
    %288 = arith.addf %284, %287 : vector<16x64xf32>
    %cst_127 = arith.constant 5.000000e-01 : f32
    %289 = vector.broadcast %cst_127 : f32 to vector<16x64xf32>
    %290 = arith.mulf %289, %288 : vector<16x64xf32>
    %cst_128 = arith.constant 4.471500e-02 : f32
    %291 = vector.broadcast %cst_128 : f32 to vector<16x64xf32>
    %292 = arith.mulf %291, %288 : vector<16x64xf32>
    %293 = arith.mulf %292, %288 : vector<16x64xf32>
    %294 = arith.mulf %293, %288 : vector<16x64xf32>
    %295 = arith.addf %288, %294 : vector<16x64xf32>
    %cst_129 = arith.constant 0.797884583 : f32
    %296 = vector.broadcast %cst_129 : f32 to vector<16x64xf32>
    %297 = arith.mulf %296, %295 : vector<16x64xf32>
    %298 = math.tanh %297 : vector<16x64xf32>
    %cst_130 = arith.constant 1.000000e+00 : f32
    %299 = vector.broadcast %cst_130 : f32 to vector<16x64xf32>
    %300 = arith.addf %299, %298 : vector<16x64xf32>
    %301 = arith.mulf %290, %300 : vector<16x64xf32>
    %c1_131 = arith.constant 1 : index
    %c0_132 = arith.constant 0 : index
    %c0_133 = arith.constant 0 : index
    %302 = vector.load %arg16[%c1_131, %c0_132, %c0_133] : memref<2x64x32xf32, #tpu.memory_space<vmem>>, vector<1x64x32xf32>
    %303 = vector.shape_cast %302 : vector<1x64x32xf32> to vector<64x32xf32>
    %cst_134 = arith.constant dense<0.000000e+00> : vector<16x32xf32>
    %304 = tpu.matmul %301, %303, %cst_134 {dimension_numbers = #tpu.dot_dimension_numbers<[1], [0], [0], [1], [0, 0, 1, 1], [], []>} : vector<16x64xf32>, vector<64x32xf32>, vector<16x32xf32> -> vector<16x32xf32>
    %c1_135 = arith.constant 1 : index
    %c0_136 = arith.constant 0 : index
    %c0_137 = arith.constant 0 : index
    %305 = vector.load %arg17[%c1_135, %c0_136, %c0_137] : memref<2x1x32xf32, #tpu.memory_space<vmem>>, vector<1x1x32xf32>
    %306 = vector.shape_cast %305 : vector<1x1x32xf32> to vector<1x32xf32>
    %307 = vector.broadcast %306 : vector<1x32xf32> to vector<16x32xf32>
    %308 = arith.addf %304, %307 : vector<16x32xf32>
    %309 = arith.addf %281, %308 : vector<16x32xf32>
    %c1_138 = arith.constant 1 : index
    %c0_139 = arith.constant 0 : index
    %c0_140 = arith.constant 0 : index
    %310 = vector.load %arg18[%c1_138, %c0_139, %c0_140] : memref<2x1x32xf32, #tpu.memory_space<vmem>>, vector<1x1x32xf32>
    %311 = vector.shape_cast %310 : vector<1x1x32xf32> to vector<1x32xf32>
    %c1_141 = arith.constant 1 : index
    %c0_142 = arith.constant 0 : index
    %c0_143 = arith.constant 0 : index
    %312 = vector.load %arg19[%c1_141, %c0_142, %c0_143] : memref<2x1x32xf32, #tpu.memory_space<vmem>>, vector<1x1x32xf32>
    %313 = vector.shape_cast %312 : vector<1x1x32xf32> to vector<1x32xf32>
    %cst_144 = arith.constant dense<0.000000e+00> : vector<16xf32>
    %314 = vector.multi_reduction <add>, %309, %cst_144 [1] : vector<16x32xf32> to vector<16xf32>
    %315 = vector.shape_cast %314 : vector<16xf32> to vector<16x1xf32>
    %cst_145 = arith.constant 3.200000e+01 : f32
    %316 = vector.broadcast %cst_145 : f32 to vector<16x1xf32>
    %317 = arith.divf %315, %316 : vector<16x1xf32>
    %318 = vector.broadcast %317 : vector<16x1xf32> to vector<16x32xf32>
    %319 = arith.subf %309, %318 : vector<16x32xf32>
    %320 = arith.mulf %319, %319 : vector<16x32xf32>
    %cst_146 = arith.constant dense<0.000000e+00> : vector<16xf32>
    %321 = vector.multi_reduction <add>, %320, %cst_146 [1] : vector<16x32xf32> to vector<16xf32>
    %322 = vector.shape_cast %321 : vector<16xf32> to vector<16x1xf32>
    %cst_147 = arith.constant 3.200000e+01 : f32
    %323 = vector.broadcast %cst_147 : f32 to vector<16x1xf32>
    %324 = arith.divf %322, %323 : vector<16x1xf32>
    %325 = vector.broadcast %317 : vector<16x1xf32> to vector<16x32xf32>
    %326 = arith.subf %309, %325 : vector<16x32xf32>
    %cst_148 = arith.constant 9.99999996E-13 : f32
    %327 = vector.broadcast %cst_148 : f32 to vector<16x1xf32>
    %328 = arith.addf %324, %327 : vector<16x1xf32>
    %329 = math.rsqrt %328 : vector<16x1xf32>
    %330 = vector.broadcast %329 : vector<16x1xf32> to vector<16x32xf32>
    %331 = arith.mulf %326, %330 : vector<16x32xf32>
    %332 = vector.broadcast %311 : vector<1x32xf32> to vector<16x32xf32>
    %333 = arith.mulf %331, %332 : vector<16x32xf32>
    %334 = vector.broadcast %313 : vector<1x32xf32> to vector<16x32xf32>
    %335 = arith.addf %333, %334 : vector<16x32xf32>
    %336 = vector.extract_strided_slice %335 {offsets = [0, 0], sizes = [1, 32], strides = [1, 1]} : vector<16x32xf32> to vector<1x32xf32>
    %337 = vector.extract_strided_slice %335 {offsets = [8, 0], sizes = [1, 32], strides = [1, 1]} : vector<16x32xf32> to vector<1x32xf32>
    %338 = tpu.concatenate %336, %337 in 0 : vector<1x32xf32>, vector<1x32xf32> -> vector<2x32xf32>
    %c0_149 = arith.constant 0 : index
    %c0_150 = arith.constant 0 : index
    %339 = vector.load %arg20[%c0_149, %c0_150] : memref<32x32xf32, #tpu.memory_space<vmem>>, vector<32x32xf32>
    %cst_151 = arith.constant dense<0.000000e+00> : vector<2x32xf32>
    %340 = tpu.matmul %338, %339, %cst_151 {dimension_numbers = #tpu.dot_dimension_numbers<[1], [0], [0], [1], [0, 0, 1, 1], [], []>} : vector<2x32xf32>, vector<32x32xf32>, vector<2x32xf32> -> vector<2x32xf32>
    %c0_152 = arith.constant 0 : index
    %c0_153 = arith.constant 0 : index
    %341 = vector.load %arg21[%c0_152, %c0_153] : memref<1x32xf32, #tpu.memory_space<vmem>>, vector<1x32xf32>
    %342 = vector.broadcast %341 : vector<1x32xf32> to vector<2x32xf32>
    %343 = arith.addf %340, %342 : vector<2x32xf32>
    %344 = math.tanh %343 : vector<2x32xf32>
    %c0_154 = arith.constant 0 : index
    %c0_155 = arith.constant 0 : index
    %345 = vector.load %arg22[%c0_154, %c0_155] : memref<32x16xf32, #tpu.memory_space<vmem>>, vector<32x16xf32>
    %cst_156 = arith.constant dense<0.000000e+00> : vector<2x16xf32>
    %346 = tpu.matmul %344, %345, %cst_156 {dimension_numbers = #tpu.dot_dimension_numbers<[1], [0], [0], [1], [0, 0, 1, 1], [], []>} : vector<2x32xf32>, vector<32x16xf32>, vector<2x16xf32> -> vector<2x16xf32>
    %c0_157 = arith.constant 0 : index
    %c0_158 = arith.constant 0 : index
    %347 = vector.load %arg23[%c0_157, %c0_158] : memref<1x16xf32, #tpu.memory_space<vmem>>, vector<1x16xf32>
    %348 = vector.broadcast %347 : vector<1x16xf32> to vector<2x16xf32>
    %349 = arith.addf %346, %348 : vector<2x16xf32>
    %cst_159 = arith.constant 0.000000e+00 : f32
    %350 = vector.broadcast %cst_159 : f32 to vector<2x16xf32>
    %351 = arith.maximumf %349, %350 : vector<2x16xf32>
    %c0_160 = arith.constant 0 : index
    %c0_161 = arith.constant 0 : index
    %352 = vector.load %arg24[%c0_160, %c0_161] : memref<1x16xf32, #tpu.memory_space<vmem>>, vector<1x16xf32>
    %353 = vector.broadcast %352 : vector<1x16xf32> to vector<2x16xf32>
    %354 = arith.mulf %351, %353 : vector<2x16xf32>
    %cst_162 = arith.constant dense<0.000000e+00> : vector<2xf32>
    %355 = vector.multi_reduction <add>, %354, %cst_162 [1] : vector<2x16xf32> to vector<2xf32>
    %356 = vector.shape_cast %355 : vector<2xf32> to vector<2x1xf32>
    %c0_163 = arith.constant 0 : index
    %c0_164 = arith.constant 0 : index
    %357 = vector.load %arg25[%c0_163, %c0_164] : memref<1x1xf32, #tpu.memory_space<vmem>>, vector<1x1xf32>
    %358 = vector.broadcast %357 : vector<1x1xf32> to vector<2x1xf32>
    %359 = arith.addf %356, %358 : vector<2x1xf32>
    %c0_165 = arith.constant 0 : index
    %c0_166 = arith.constant 0 : index
    %360 = vector.load %arg26[%c0_165, %c0_166] : memref<32x32xf32, #tpu.memory_space<vmem>>, vector<32x32xf32>
    %cst_167 = arith.constant dense<0.000000e+00> : vector<2x32xf32>
    %361 = tpu.matmul %344, %360, %cst_167 {dimension_numbers = #tpu.dot_dimension_numbers<[1], [0], [0], [1], [0, 0, 1, 1], [], []>} : vector<2x32xf32>, vector<32x32xf32>, vector<2x32xf32> -> vector<2x32xf32>
    %c0_168 = arith.constant 0 : index
    %c0_169 = arith.constant 0 : index
    %362 = vector.load %arg27[%c0_168, %c0_169] : memref<1x32xf32, #tpu.memory_space<vmem>>, vector<1x32xf32>
    %363 = vector.broadcast %362 : vector<1x32xf32> to vector<2x32xf32>
    %364 = arith.addf %361, %363 : vector<2x32xf32>
    %365 = math.tanh %364 : vector<2x32xf32>
    %cst_170 = arith.constant 0.000000e+00 : f32
    %366 = vector.broadcast %cst_170 : f32 to vector<2x63xf32>
    %367 = tpu.concatenate %359, %365, %344, %366 in 1 : vector<2x1xf32>, vector<2x32xf32>, vector<2x32xf32>, vector<2x63xf32> -> vector<2x128xf32>
    %c0_171 = arith.constant 0 : index
    %c0_172 = arith.constant 0 : index
    %368 = vector.load %arg28[%c0_171, %c0_172] : memref<2x128xf32, #tpu.memory_space<vmem>>, vector<2x128xf32>
    tpu.vector_store %arg28[%c0_171, %c0_172], %367 {strides = array<i32>} : memref<2x128xf32, #tpu.memory_space<vmem>>, vector<2x128xf32>,
    return
  }
}

</mosaic_0001>

<bundles_post_ra>
// kernel: enhanced_recipe_chatbot_forward.1
= control target key start
LH: loop header
LB: loop body
LE: loop exit
PB: predicated region body
PF: predicated region fallthrough
CT: control target
= control target key end

     0   :  { %s2648_s0 = inlined_call_operand.vmem [shape: s32[16,1], index: 0, kind: input, shape index: {}]   ;;  %s2649_s1 = inlined_call_operand.vmem [shape: s32[16,1], index: 1, kind: input, shape index: {}]   ;;  %s2650_s2 = inlined_call_operand.vmem [shape: f32[2,8], index: 2, kind: input, shape index: {}]   ;;  %s2651_s3 = inlined_call_operand.vmem [shape: f32[64,32], index: 3, kind: input, shape index: {}]   ;;  %s2652_s4 = inlined_call_operand.hbm [shape: f32[16,32], index: 4, kind: input, shape index: {}]   ;;  %s2653_s5 = inlined_call_operand.vmem [shape: f32[2,32], index: 5, kind: input, shape index: {}]   ;;  %s2654_s6 = inlined_call_operand.hbm [shape: f32[1,32], index: 6, kind: input, shape index: {}]   ;;  %s2655_s7 = inlined_call_operand.hbm [shape: f32[1,32], index: 7, kind: input, shape index: {}]   ;;  %s2656_s8 = inlined_call_operand.vmem [shape: f32[2,32,96], index: 8, kind: input, shape index: {}]   ;;  %s2657_s9 = inlined_call_operand.vmem [shape: f32[2,1,96], index: 9, kind: input, shape index: {}]   ;;  %s2658_s10 = inlined_call_operand.vmem [shape: f32[2,32,32], index: 10, kind: input, shape index: {}]   ;;  %s2659_s11 = inlined_call_operand.hbm [shape: f32[2,1,32], index: 11, kind: input, shape index: {}]   ;;  %s2660_s12 = inlined_call_operand.vmem [shape: f32[2,1,32], index: 12, kind: input, shape index: {}]   ;;  %s2661_s13 = inlined_call_operand.vmem [shape: f32[2,1,32], index: 13, kind: input, shape index: {}]   ;;  %s2662_s14 = inlined_call_operand.vmem [shape: f32[2,32,64], index: 14, kind: input, shape index: {}]   ;;  %s2663_s15 = inlined_call_operand.hbm [shape: f32[2,1,64], index: 15, kind: input, shape index: {}]   ;;  %s2664_s16 = inlined_call_operand.vmem [shape: f32[2,64,32], index: 16, kind: input, shape index: {}]   ;;  %s2665_s17 = inlined_call_operand.hbm [shape: f32[2,1,32], index: 17, kind: input, shape index: {}]   ;;  %s2666_s18 = inlined_call_operand.vmem [shape: f32[2,1,32], index: 18, kind: input, shape index: {}]   ;;  %s2667_s19 = inlined_call_operand.hbm [shape: f32[2,1,32], index: 19, kind: input, shape index: {}]   ;;  %s2668_s20 = inlined_call_operand.vmem [shape: f32[32,32], index: 20, kind: input, shape index: {}]   ;;  %s2669_s21 = inlined_call_operand.vmem [shape: f32[1,32], index: 21, kind: input, shape index: {}]   ;;  %s2670_s22 = inlined_call_operand.vmem [shape: f32[32,16], index: 22, kind: input, shape index: {}]   ;;  %s2671_s23 = inlined_call_operand.vmem [shape: f32[1,16], index: 23, kind: input, shape index: {}]   ;;  %s2672_s24 = inlined_call_operand.vmem [shape: f32[1,16], index: 24, kind: input, shape index: {}]   ;;  %s2673_s25 = inlined_call_operand.<no memory space> [shape: f32[1,1], index: 25, kind: input, shape index: {}]   ;;  %s2674_s26 = inlined_call_operand.vmem [shape: f32[32,32], index: 26, kind: input, shape index: {}]   ;;  %s2675_s27 = inlined_call_operand.hbm [shape: f32[1,32], index: 27, kind: input, shape index: {}]   ;;  %s2676_s28 = inlined_call_operand.vmem [shape: f32[2,128], index: 28, kind: output, shape index: {}]  }
   0x1   :  { %2686 = sst [smem:[#allocation21_spill]] %s2648_s0  ;;  %v33_v0 = vstv %s2673_s25 }
   0x2   :  { %2687 = sst [smem:[#allocation22_spill]] %s2649_s1  ;;  %34 = vst [vmem:[#allocation2] sm:$0x1] %v33_v0 }
   0x3   :  { %2688 = sst [smem:[#allocation23_spill]] %s2650_s2 }
   0x4   :  { %2689 = sst [smem:[#allocation24_spill]] %s2651_s3 }
   0x5   :  { %2690 = sst [smem:[#allocation25_spill]] %s2652_s4 }
   0x6   :  { %2691 = sst [smem:[#allocation26_spill]] %s2653_s5 }
   0x7   :  { %2692 = sst [smem:[#allocation27_spill]] %s2654_s6 }
   0x8   :  { %2693 = sst [smem:[#allocation28_spill]] %s2655_s7 }
   0x9   :  { %2694 = sst [smem:[#allocation29_spill]] %s2656_s8 }
   0xa   :  { %2695 = sst [smem:[#allocation30_spill]] %s2657_s9 }
   0xb   :  { %2696 = sst [smem:[#allocation31_spill]] %s2658_s10 }
   0xc   :  { %2697 = sst [smem:[#allocation32_spill]] %s2659_s11 }
   0xd   :  { %2698 = sst [smem:[#allocation33_spill]] %s2660_s12 }
   0xe   :  { %2699 = sst [smem:[#allocation34_spill]] %s2676_s28 }
   0xf   :  { %35 = vsyncpa [#allocation4], 0 }
  0x10   :  { %36 = vsyncpa [#allocation6], 0 }
  0x11   :  { %37 = vsyncpa [#allocation9], 0 }
  0x12   :  { %38 = vsyncpa [#allocation12], 0  ;;  %s2700_s3 = sld [smem:[#allocation27_spill]] }
  0x18   :  { %s68_s6 = sshll.u32 %s2700_s3, 4  ;;  %s69_s6 = int_to_ptr.hbm [resolvable:$true] %s68_s6 }
  0x19   :  { %39 = vsyncpa [#allocation15], 0  ;;  %s2032_s10 = smov [#allocation5]   ;;  %s2701_s2 = sld [smem:[#allocation32_spill]] }
  0x1a   :  { %s70_s0 = sshll.u32 %s2032_s10, 4  ;;  %s2033_s25 = smov [#allocation8]   ;;  %s71_s0 = int_to_ptr.vmem [resolvable:$true] %s70_s0 }
  0x1b   :  { %73 = dma.hbm_to_vmem [thread:$0]  %s69_s6, 16, %s71_s0, [#allocation6]  }
  0x1c   :  { %s97_s12 = sshll.u32 %s2033_s25, 4  ;;  %s2684_s1 = smov 16   ;;  %s98_s12 = int_to_ptr.vmem [resolvable:$true] %s97_s12 }
  0x1d   :  { %s2035_s4 = smov 1   ;;  %s129_s9 = sshll.u32 %s2665_s17, 4  ;;  %s130_s9 = int_to_ptr.hbm [resolvable:$true] %s129_s9 }
  0x1e   :  { %s2036_s30 = smov [#allocation11]   ;;  %s2702_s0 = sld [smem:[#allocation25_spill]] }
  0x1f   :  { %s95_s7 = sshll.u32 %s2701_s2, 4  ;;  %s131_s3 = sshll.u32 %s2036_s30, 4  ;;  %s96_s7 = int_to_ptr.hbm [resolvable:$true] %s95_s7  ;;  %s132_s3 = int_to_ptr.vmem [resolvable:$true] %s131_s3 }
  0x20   :  { %103 = dma.hbm_to_vmem [thread:$0]  %s96_s7, 32, %s98_s12, [#allocation9], %s2684_s1, %s2684_s1, %s2035_s4  }
  0x21   :  { %137 = dma.hbm_to_vmem [thread:$0]  %s130_s9, 32, %s132_s3, [#allocation12], %s2684_s1, %s2684_s1, %s2035_s4  }
  0x22   :  { %s2037_s29 = smov [#allocation3]   ;;  %s2038_s7 = smov 128  }
  0x23   :  { %s54_s2 = sshll.u32 %s2037_s29, 4  ;;  %s2039_s25 = smov 8   ;;  %s55_s2 = int_to_ptr.vmem [resolvable:$true] %s54_s2 }
  0x24   :  { %s52_s11 = sshll.u32 %s2702_s0, 4  ;;  %s2703_s8 = sld [smem:[#allocation28_spill]]  ;;  %s53_s11 = int_to_ptr.hbm [resolvable:$true] %s52_s11 }
  0x25   :  { %60 = dma.hbm_to_vmem [thread:$0]  %s53_s11, 256, %s55_s2, [#allocation4], %s2038_s7, %s2038_s7, %s2039_s25  }
  0x26   :  { %s2040_s30 = smov [#allocation7]   ;;  %s114_s0 = sshll.u32 %s2663_s15, 4  ;;  %s115_s0 = int_to_ptr.hbm [resolvable:$true] %s114_s0 }
  0x27   :  { %s81_s28 = sshll.u32 %s2040_s30, 4  ;;  %s2041_s9 = smov [#allocation10]   ;;  %s82_s28 = int_to_ptr.vmem [resolvable:$true] %s81_s28 }
  0x28   :  { %s116_s3 = sshll.u32 %s2041_s9, 4  ;;  %s144_s11 = sshll.u32 %s2667_s19, 4  ;;  %s117_s3 = int_to_ptr.vmem [resolvable:$true] %s116_s3  ;;  %s145_s11 = int_to_ptr.hbm [resolvable:$true] %s144_s11 }
  0x29   :  { %s2704_s2 = smov 16   ;;  %s172_s17 = sshll.u32 %s2675_s27, 4  ;;  %s173_s17 = int_to_ptr.hbm [resolvable:$true] %s172_s17 }
  0x2a   :  { %s79_s5 = sshll.u32 %s2703_s8, 4  ;;  %s2042_s12 = smov [#allocation13]   ;;  %s80_s5 = int_to_ptr.hbm [resolvable:$true] %s79_s5 }
  0x2b   :  { %84 = dma.hbm_to_vmem [thread:$0]  %s80_s5, 16, %s82_s28, [#allocation6]  }
  0x2c   :  { %122 = dma.hbm_to_vmem [thread:$0]  %s115_s0, 32, %s117_s3, [#allocation9], %s2704_s2, %s2704_s2, %s2035_s4  }
  0x2d   :  { %s146_s15 = sshll.u32 %s2042_s12, 4  ;;  %s2043_s28 = smov [#allocation14]   ;;  %s147_s15 = int_to_ptr.vmem [resolvable:$true] %s146_s15 }
  0x2e   :  { %152 = dma.hbm_to_vmem [thread:$0]  %s145_s11, 32, %s147_s15, [#allocation12], %s2704_s2, %s2704_s2, %s2035_s4  }
  0x2f   :  { %s174_s19 = sshll.u32 %s2043_s28, 4  ;;  %s175_s19 = int_to_ptr.vmem [resolvable:$true] %s174_s19 }
  0x30   :  { %177 = dma.hbm_to_vmem [thread:$0]  %s173_s17, 16, %s175_s19, [#allocation15]  }
  0x31   :  { %2022 = dma.done.wait [#allocation4], 256  }
  0x32   :  { %2023 = vsyncadd [#allocation4], 4294967040 }
  0x33   :  { %2024 = dma.done.wait [#allocation6], 32  }
  0x34   :  { %2025 = vsyncadd [#allocation6], 4294967264 }
  0x35   :  { %2026 = dma.done.wait [#allocation9], 64  }
  0x36   :  { %2027 = vsyncadd [#allocation9], 4294967232 }
  0x37   :  { %2028 = dma.done.wait [#allocation12], 64  }
  0x38   :  { %2029 = vsyncadd [#allocation12], 4294967232 }
  0x39   :  { %2030 = dma.done.wait [#allocation15], 16  }
  0x3a   :  { %2031 = vsyncadd [#allocation15], 4294967280  ;;  %v2044_v1 = vmov 0   ;;  %s2705_s8 = sld [smem:[#allocation21_spill]]  ;;  %v218_v16 = vlaneseq  ;;  %vm254_vm2 = vcmask 523264   ;;  %v2045_v19 = vmov 0.0  }
  0x3b   :  { %1724 = vset.pattern.permute.xlu0 %v2044_v1  ;;  %1725 = vset.pattern.permute.xlu1 %v2044_v1  ;;  %s2706_s10 = sld [smem:[#allocation24_spill]]  ;;  %v253_v27 = vld [vmem:[#allocation3] sm:$0xff]  ;;  %vm288_vm6 = vcmask 261120   ;;  %v2046_v39 = vmov 32.0   ;;  %s2047_s30 = smov 96   ;;  %vm399_vm15 = vcmask 130048  }
  0x3c   :  { %s2707_s6 = sld [smem:[#allocation22_spill]]  ;;  %v219_v17 = vand.u32 127, %v218_v16  ;;  %1764 = vrcp.f32 %v2046_v39  ;;  %s2049_s3 = smov 80  }
  0x3d   :  { %s2708_s29 = sld [smem:[#allocation26_spill]]  ;;  %s2051_s11 = smov 48  }
  0x3e   :  { %s2709_s25 = sld [smem:[#allocation29_spill]] }
  0x3f   :  { %s2710_s5 = sld [smem:[#allocation30_spill]] }
  0x40   :  { %v210_v2 = vld [vmem:[%s2705_s8] sm:$0xff]  ;;  %v211_v7 = vld [vmem:[%s2705_s8 + $0x8] sm:$0xff]  ;;  %s2712_s12 = sld [smem:[#allocation31_spill]] }
  0x41   :  { %v233_v3 = vld [vmem:[%s2706_s10 + $0x38] sm:$0xff]  ;;  %213 = vperm.xlu0 %1724, %v210_v2   ;;  %v232_v4 = vld [vmem:[%s2706_s10 + $0x30] sm:$0xff]  ;;  %v231_v5 = vld [vmem:[%s2706_s10 + $0x28] sm:$0xff]  ;;  %s2713_s8 = sld [smem:[#allocation33_spill]] }
  0x42   :  { %269 = vmatpush.msra.mxu0 %v233_v3  ;;  %v230_v6 = vld [vmem:[%s2706_s10 + $0x20] sm:$0xff]  ;;  %v229_v8 = vld [vmem:[%s2706_s10 + $0x18] sm:$0xff]  ;;  %v228_v9 = vld [vmem:[%s2706_s10 + $0x10] sm:$0xff]  ;;  %v1765_v40 = vpop.eup %1764  ;;  %s2714_s19 = sld [smem:[#allocation34_spill]] }
  0x43   :  { %v227_v10 = vld [vmem:[%s2706_s10 + $0x8] sm:$0xff]  ;;  %v226_v11 = vld [vmem:[%s2706_s10] sm:$0xff]  ;;  %v296_v41 = vmul.f32 32.0, %v1765_v40  ;;  %vm300_vm8 = vweird.f32 %v1765_v40  ;;  %s2711_s10 = sld [smem:[#allocation23_spill]] }
  0x44   :  { %270 = vmatpush.msra.mxu0 %v232_v4  ;;  %v235_v12 = vld [vmem:[%s2707_s6] sm:$0xff]  ;;  %v236_v14 = vld [vmem:[%s2707_s6 + $0x8] sm:$0xff]  ;;  %v362_v56 = vld [vmem:[%s2709_s25 + $0x18] sm:$0xff]  ;;  %s2048_s6 = smov 64  }
  0x45   :  { %vm237_vm0 = vcmp.eq.s32.totalorder %v235_v12, 0  ;;  %vm238_vm1 = vcmp.eq.s32.totalorder %v236_v14, 0  ;;  %v234_v23 = vld [vmem:[%s2708_s29] sm:$0x3]  ;;  %v297_v42 = vsub.f32 1.0, %v296_v41  ;;  %385 = vmatpush.msra.mxu1 %v362_v56  ;;  %v361_v57 = vld [vmem:[%s2709_s25 + $0x10] sm:$0xff] }
  0x46   :  { %271 = vmatpush.msra.mxu0 %v231_v5  ;;  %v239_v13 = vsel %vm237_vm0, 1, %v2044_v1  ;;  %v240_v15 = vsel %vm238_vm1, 1, %v2044_v1  ;;  %v249_v25 = vperm.slane %v234_v23, 0  ;;  %v250_v26 = vperm.slane %v234_v23, 1  ;;  %v360_v58 = vld [vmem:[%s2709_s25 + $0x8] sm:$0xff]  ;;  %v359_v59 = vld [vmem:[%s2709_s25] sm:$0xff] }
  0x47   :  { %242 = vperm.xlu1 %1725, %v239_v13   ;;  %v298_v43 = vmul.f32 %v1765_v40, %v297_v42  ;;  %386 = vmatpush.msra.mxu1 %v361_v57  ;;  %v1742_v14 = vld [vmem:[#allocation7] ss:$0 sm:$0xff]  ;;  %vm455_vm0 = vcmask 64512   ;;  %s2050_s29 = smov 112  }
  0x48   :  { %272 = vmatpush.msra.mxu0 %v230_v6 }
  0x49   :  { %216 = vperm.xlu0 %1724, %v211_v7   ;;  %v299_v44 = vadd.f32 %v1765_v40, %v298_v43  ;;  %387 = vmatpush.msra.mxu1 %v360_v58 }
  0x4a   :  { %273 = vmatpush.msra.mxu0 %v229_v8 }
  0x4b   :  { %v2280_v45 = vsel %vm300_vm8, %v1765_v40, %v299_v44  ;;  %388 = vmatpush.msra.mxu1 %v359_v59 }
  0x4c   :  { %274 = vmatpush.msra.mxu0 %v228_v9 }
  0x4e   :  { %275 = vmatpush.msra.mxu0 %v227_v10  ;;  %v1741_v10 = vld [vmem:[#allocation5] ss:$0 sm:$0xff] }
  0x4f   :  { %245 = vperm.xlu1 %1725, %v240_v15  }
  0x50   :  { %276 = vmatpush.msra.mxu0 %v226_v11 }
  0xb3   :  { %v214_v18 = vpop.permute.xlu0 %213 }
  0xb4   :  { %vm220_vm3 = vcmp.eq.s32.totalorder %v214_v18, %v219_v17 }
  0xb5   :  { %v1632_v20 = vsel %vm220_vm3, 1.0, %v2045_v19 }
  0xb6   :  { %1634 = vmatmul.msk.f32.vlgmr.msra.gmra.mxu0 %vm254_vm2, %v1632_v20 }
  0xb9   :  { %v243_v24 = vpop.permute.xlu1 %242 }
  0xba   :  { %vm247_vm5 = vcmp.eq.s32.totalorder %v243_v24, 1 }
  0xbb   :  { %v217_v21 = vpop.permute.xlu0 %216  ;;  %v251_v29 = vsel %vm247_vm5, %v249_v25, %v250_v26 }
  0xbc   :  { %vm221_vm4 = vcmp.eq.s32.totalorder %v217_v21, %v219_v17 }
  0xbd   :  { %v1633_v22 = vsel %vm221_vm4, 1.0, %v2045_v19 }
  0xbe   :  { %1635 = vmatmul.msk.f32.gmra.mxu0 %vm254_vm2, %v1633_v22 }
  0xc1   :  { %v246_v32 = vpop.permute.xlu1 %245 }
  0xc2   :  { %vm248_vm7 = vcmp.eq.s32.totalorder %v246_v32, 1 }
  0xc3   :  { %v252_v36 = vsel %vm248_vm7, %v249_v25, %v250_v26  ;;  %v1743_v25 = vld [vmem:[%s2710_s5] ss:$0 sm:$0xff] }
 0x133   :  { %v278_v28 = vpop.f32.mrf.mxu0 }
 0x134   :  { %v279_v30 = vadd.f32 %v278_v28, %v253_v27 }
 0x136   :  { %v284_v31 = vadd.f32 %v279_v30, %v251_v29 }
 0x138   :  { %v289_v33 = vsel %vm288_vm6, %v284_v31, 0.0 }
 0x139   :  { %290 = vadd.xlane.f32.xlu2 %v289_v33 }
 0x13b   :  { %v281_v34 = vpop.f32.mrf.mxu0 }
 0x13c   :  { %v282_v35 = vadd.f32 %v281_v34, %v253_v27 }
 0x13e   :  { %v285_v37 = vadd.f32 %v282_v35, %v252_v36  ;;  %v350_v35 = vld [vmem:[%s2711_s10] sm:$0x3] }
 0x13f   :  { %v351_v36 = vsub.f32 1.0, %v350_v35 }
 0x140   :  { %v292_v38 = vsel %vm288_vm6, %v285_v37, 0.0 }
 0x141   :  { %293 = vadd.xlane.f32.xlu2 %v292_v38 }
 0x1ac   :  { %v291_v46 = vpop.xlane.xlu2 %290 }
 0x1ad   :  { %v302_v47 = vmul.f32 %v2280_v45, %v291_v46 }
 0x1af   :  { %v304_v48 = vsub.f32 %v284_v31, %v302_v47 }
 0x1b1   :  { %v306_v49 = vmul.f32 %v304_v48, %v304_v48 }
 0x1b3   :  { %v308_v50 = vsel %vm288_vm6, %v306_v49, 0.0 }
 0x1b4   :  { %309 = vadd.xlane.f32.xlu0 %v308_v50  ;;  %v294_v51 = vpop.xlane.xlu2 %293 }
 0x1b5   :  { %v303_v52 = vmul.f32 %v2280_v45, %v294_v51 }
 0x1b7   :  { %v305_v53 = vsub.f32 %v285_v37, %v303_v52  ;;  %v352_v37 = vmul.f32 -1e+09, %v351_v36 }
 0x1b9   :  { %v307_v54 = vmul.f32 %v305_v53, %v305_v53  ;;  %v354_v38 = vrot.slane %v352_v37, 1  ;;  %v2326_v42 = vperm.slane %v352_v37, 0 }
 0x1bb   :  { %v311_v55 = vsel %vm288_vm6, %v307_v54, 0.0  ;;  %v2324_v39 = vperm.slane %v354_v38, 0 }
 0x1bc   :  { %312 = vadd.xlane.f32.xlu1 %v311_v55 }
 0x227   :  { %v310_v60 = vpop.xlane.xlu0 %309 }
 0x228   :  { %v314_v61 = vmul.f32 %v310_v60, %v2280_v45 }
 0x22a   :  { %v316_v62 = vadd.f32 1e-12, %v314_v61 }
 0x22c   :  { %1766 = vrsqrt.f32 %v316_v62  ;;  %vm324_vm10 = vweird.f32 %v316_v62 }
 0x22f   :  { %v313_v63 = vpop.xlane.xlu1 %312 }
 0x230   :  { %v315_v0 = vmul.f32 %v313_v63, %v2280_v45 }
 0x232   :  { %v1767_v1 = vpop.eup %1766  ;;  %v317_v2 = vadd.f32 1e-12, %v315_v0 }
 0x233   :  { %v319_v3 = vmul.f32 %v1767_v1, %v316_v62  ;;  %vm325_vm9 = vweird.f32 %v1767_v1 }
 0x234   :  { %1768 = vrsqrt.f32 %v317_v2  ;;  %vm326_vm11 = vmor %vm324_vm10, %vm325_vm9  ;;  %vm334_vm13 = vweird.f32 %v317_v2 }
 0x235   :  { %v320_v4 = vmul.f32 %v1767_v1, %v319_v3 }
 0x237   :  { %v321_v5 = vmul.f32 0.5, %v320_v4 }
 0x239   :  { %v322_v6 = vsub.f32 1.5, %v321_v5 }
 0x23a   :  { %v1769_v7 = vpop.eup %1768 }
 0x23b   :  { %v323_v8 = vmul.f32 %v1767_v1, %v322_v6  ;;  %v329_v9 = vmul.f32 %v1769_v7, %v317_v2  ;;  %vm335_vm12 = vweird.f32 %v1769_v7 }
 0x23c   :  { %vm336_vm14 = vmor %vm334_vm13, %vm335_vm12 }
 0x23d   :  { %v327_v11 = vsel %vm326_vm11, %v1767_v1, %v323_v8  ;;  %v330_v12 = vmul.f32 %v1769_v7, %v329_v9 }
 0x23e   :  { %v338_v13 = vmul.f32 %v327_v11, %v304_v48 }
 0x23f   :  { %v331_v15 = vmul.f32 0.5, %v330_v12 }
 0x240   :  { %v343_v16 = vmul.f32 %v1741_v10, %v338_v13 }
 0x241   :  { %v332_v17 = vsub.f32 1.5, %v331_v15 }
 0x242   :  { %v2300_v18 = vadd.f32 %v1742_v14, %v343_v16 }
 0x243   :  { %v333_v19 = vmul.f32 %v1769_v7, %v332_v17 }
 0x244   :  { %1636 = vmatmul.msk.f32.vlgmr.msra.gmra.mxu1 %vm288_vm6, %v2300_v18 }
 0x245   :  { %v337_v20 = vsel %vm336_vm14, %v1769_v7, %v333_v19 }
 0x246   :  { %v339_v21 = vmul.f32 %v337_v20, %v305_v53 }
 0x248   :  { %v344_v22 = vmul.f32 %v1741_v10, %v339_v21 }
 0x24a   :  { %v2304_v23 = vadd.f32 %v1742_v14, %v344_v22 }
 0x24c   :  { %1637 = vmatmul.msk.f32.gmra.mxu1 %vm288_vm6, %v2304_v23 }
 0x2c1   :  { %v390_v24 = vpop.f32.mrf.mxu1 }
 0x2c2   :  { %v391_v27 = vadd.f32 %v1743_v25, %v390_v24 }
 0x2c9   :  { %v393_v26 = vpop.f32.mrf.mxu1 }
 0x2ca   :  { %v394_v28 = vadd.f32 %v1743_v25, %v393_v26 }
 0x2cc   :  { %425 = vrot.lane.b32.xlu2 %v394_v28, %s2047_s30  ;;  %v2312_v29 = vpack.i.bf16 %v394_v28, %v391_v27 }
 0x2ce   :  { %1727 = vrot.lane.b32.xlu1 %v2312_v29, %s2048_s6 }
 0x2d4   :  { %397 = vrot.lane.b32.xlu2 %v391_v27, %s2047_s30 }
 0x326   :  { %v426_v30 = vpop.permute.xlu2 %425 }
 0x327   :  { %1640 = vmatpush.xpose.msk.msra.mxu3 %vm399_vm15, %v426_v30 }
 0x32a   :  { %1641 = vmatmul.msk.f32.vlgmr.msra.gmra.mxu3 %vm399_vm15, %v394_v28 }
 0x32e   :  { %v398_v31 = vpop.permute.xlu2 %397 }
 0x32f   :  { %1638 = vmatpush.xpose.msk.msrb.mxu1 %vm399_vm15, %v398_v31 }
 0x332   :  { %1639 = vmatmul.msk.f32.vlgmr.msrb.gmra.mxu1 %vm399_vm15, %v391_v27 }
 0x340   :  { %v1728_v32 = vpop.permute.xlu1 %1727 }
 0x341   :  { %v1729_v33 = vunpack.i.l.bf16 %v1728_v32  ;;  %v1730_v34 = vunpack.i.h.bf16 %v1728_v32 }
 0x343   :  { %499 = vmatpush.msra.mxu2 %v1729_v33  ;;  %525 = vmatpush.msrb.mxu3 %v1730_v34 }
 0x3ad   :  { %v448_v40 = vpop.f32.mrf.mxu3 }
 0x3ae   :  { %v452_v41 = vmul.f32 0.25, %v448_v40  ;;  %v677_v40 = vld [vmem:[%s2712_s12 + $0x18] sm:$0xff] }
 0x3af   :  { %v421_v43 = vpop.f32.mrf.mxu1 }
 0x3b0   :  { %v451_v44 = vmul.f32 0.25, %v421_v43  ;;  %v454_v46 = vadd.f32 %v452_v41, %v2324_v39  ;;  %v676_v41 = vld [vmem:[%s2712_s12 + $0x10] sm:$0xff]  ;;  %v675_v43 = vld [vmem:[%s2712_s12 + $0x8] sm:$0xff] }
 0x3b2   :  { %v459_v47 = vsel %vm455_vm0, %v454_v46, -inf  ;;  %v453_v48 = vadd.f32 %v451_v44, %v2326_v42  ;;  %v674_v44 = vld [vmem:[%s2712_s12] sm:$0xff] }
 0x3b3   :  { %460 = vmax.xlane.f32.xlu0 %v459_v47 }
 0x3b4   :  { %v456_v49 = vsel %vm455_vm0, %v453_v48, -inf }
 0x3b5   :  { %457 = vmax.xlane.f32.xlu2 %v456_v49 }
 0x3c7   :  { %532 = vrot.lane.b32.xlu0 %v391_v27, %s2049_s3 }
 0x3cd   :  { %560 = vrot.lane.b32.xlu2 %v394_v28, %s2049_s3 }
 0x426   :  { %v461_v50 = vpop.xlane.xlu0 %460 }
 0x427   :  { %v463_v51 = vsub.f32 %v454_v46, %v461_v50  ;;  %v1744_v50 = vld [vmem:[#allocation8] ss:$0 sm:$0xff] }
 0x428   :  { %v458_v52 = vpop.xlane.xlu2 %457 }
 0x429   :  { %v466_v53 = vmul.f32 1.442695, %v463_v51  ;;  %v462_v54 = vsub.f32 %v453_v48, %v458_v52 }
 0x42b   :  { %1770 = vpow2.f32 %v466_v53  ;;  %v464_v55 = vmul.f32 1.442695, %v462_v54 }
 0x42d   :  { %1772 = vpow2.f32 %v464_v55 }
 0x430   :  { %v561_v56 = vpop.permute.xlu2 %560 }
 0x431   :  { %v1771_v57 = vpop.eup %1770  ;;  %1646 = vmatpush.xpose.msk.msra.mxu3 %vm399_vm15, %v561_v56 }
 0x432   :  { %v471_v58 = vsel %vm455_vm0, %v1771_v57, 0.0 }
 0x433   :  { %v1773_v59 = vpop.eup %1772  ;;  %472 = vadd.xlane.f32.xlu0 %v471_v58 }
 0x434   :  { %v468_v60 = vsel %vm455_vm0, %v1773_v59, 0.0 }
 0x435   :  { %469 = vadd.xlane.f32.xlu1 %v468_v60 }
 0x439   :  { %v533_v61 = vpop.permute.xlu0 %532 }
 0x43a   :  { %1644 = vmatpush.xpose.msk.msrb.mxu2 %vm399_vm15, %v533_v61 }
 0x447   :  { %558 = vrot.lane.b32.xlu0 %v394_v28, %s2050_s29 }
 0x44e   :  { %530 = vrot.lane.b32.xlu1 %v391_v27, %s2050_s29 }
 0x4a6   :  { %v473_v62 = vpop.xlane.xlu0 %472 }
 0x4a7   :  { %1774 = vrcp.f32 %v473_v62 }
 0x4a8   :  { %v470_v63 = vpop.xlane.xlu1 %469 }
 0x4a9   :  { %1776 = vrcp.f32 %v470_v63 }
 0x4ad   :  { %v1775_v0 = vpop.eup %1774 }
 0x4ae   :  { %v477_v1 = vmul.f32 %v1775_v0, %v1771_v57 }
 0x4af   :  { %v1777_v2 = vpop.eup %1776 }
 0x4b0   :  { %1643 = vmatmul.msk.f32.vlgmr.msrb.gmra.mxu3 %vm455_vm0, %v477_v1  ;;  %v476_v3 = vmul.f32 %v1777_v2, %v1773_v59 }
 0x4b1   :  { %700 = vmatpush.msrb.mxu3 %v677_v40  ;;  %v829_v40 = vld [vmem:[%s2664_s16 + $0x28] sm:$0xff] }
 0x4b2   :  { %1642 = vmatmul.msk.f32.vlgmr.msra.gmra.mxu2 %vm455_vm0, %v476_v3 }
 0x4b3   :  { %701 = vmatpush.msrb.mxu3 %v676_v41  ;;  %v828_v41 = vld [vmem:[%s2664_s16 + $0x20] sm:$0xff] }
 0x4b5   :  { %702 = vmatpush.msrb.mxu3 %v675_v43  ;;  %v827_v43 = vld [vmem:[%s2664_s16 + $0x18] sm:$0xff] }
 0x4b7   :  { %703 = vmatpush.msrb.mxu3 %v674_v44  ;;  %v826_v44 = vld [vmem:[%s2664_s16 + $0x10] sm:$0xff] }
 0x4b9   :  { %v559_v4 = vpop.permute.xlu0 %558 }
 0x4ba   :  { %1647 = vmatmul.msk.f32.vlgmr.msra.gmra.mxu3 %vm399_vm15, %v559_v4  ;;  %v771_v4 = vld [vmem:[%s2662_s14 + $0x10] sm:$0xff] }
 0x4c0   :  { %v531_v5 = vpop.permute.xlu1 %530 }
 0x4c1   :  { %1645 = vmatmul.msk.f32.vlgmr.msrb.gmra.mxu2 %vm399_vm15, %v531_v5  ;;  %v770_v5 = vld [vmem:[%s2662_s14 + $0x8] sm:$0xff] }
 0x533   :  { %v527_v6 = vpop.f32.mrf.mxu3 }
 0x535   :  { %v501_v7 = vpop.f32.mrf.mxu2 }
 0x53d   :  { %v583_v8 = vpop.f32.mrf.mxu3 }
 0x53e   :  { %v587_v9 = vmul.f32 0.25, %v583_v8 }
 0x540   :  { %v589_v10 = vadd.f32 %v587_v9, %v2324_v39 }
 0x542   :  { %v593_v11 = vsel %vm455_vm0, %v589_v10, -inf }
 0x543   :  { %594 = vmax.xlane.f32.xlu0 %v593_v11 }
 0x544   :  { %v555_v12 = vpop.f32.mrf.mxu2 }
 0x545   :  { %v586_v13 = vmul.f32 0.25, %v555_v12 }
 0x547   :  { %v588_v14 = vadd.f32 %v586_v13, %v2326_v42 }
 0x549   :  { %v590_v15 = vsel %vm455_vm0, %v588_v14, -inf }
 0x54a   :  { %591 = vmax.xlane.f32.xlu1 %v590_v15 }
 0x557   :  { %1732 = vrot.lane.b32.xlu0 %v2312_v29, %s2051_s11 }
 0x5b6   :  { %v595_v16 = vpop.xlane.xlu0 %594 }
 0x5b7   :  { %v597_v17 = vsub.f32 %v589_v10, %v595_v16 }
 0x5b9   :  { %v600_v19 = vmul.f32 1.442695, %v597_v17 }
 0x5bb   :  { %1778 = vpow2.f32 %v600_v19 }
 0x5bd   :  { %v592_v20 = vpop.xlane.xlu1 %591 }
 0x5be   :  { %v596_v21 = vsub.f32 %v588_v14, %v592_v20 }
 0x5c0   :  { %v598_v22 = vmul.f32 1.442695, %v596_v21 }
 0x5c1   :  { %v1779_v24 = vpop.eup %1778 }
 0x5c2   :  { %1780 = vpow2.f32 %v598_v22  ;;  %v605_v25 = vsel %vm455_vm0, %v1779_v24, 0.0  ;;  %v1745_v22 = vld [vmem:[%s2713_s8] ss:$0 sm:$0xff] }
 0x5c3   :  { %606 = vadd.xlane.f32.xlu1 %v605_v25 }
 0x5c8   :  { %v1781_v26 = vpop.eup %1780 }
 0x5c9   :  { %v1733_v27 = vpop.permute.xlu0 %1732  ;;  %v602_v28 = vsel %vm455_vm0, %v1781_v26, 0.0 }
 0x5ca   :  { %v1735_v30 = vunpack.i.h.bf16 %v1733_v27  ;;  %v1734_v31 = vunpack.i.l.bf16 %v1733_v27  ;;  %603 = vadd.xlane.f32.xlu2 %v602_v28  ;;  %v1746_v27 = vld [vmem:[%s2661_s13] ss:$0 sm:$0xff] }
 0x5cc   :  { %633 = vmatpush.msra.mxu1 %v1734_v31  ;;  %659 = vmatpush.msra.mxu2 %v1735_v30 }
 0x636   :  { %v607_v29 = vpop.xlane.xlu1 %606 }
 0x637   :  { %1782 = vrcp.f32 %v607_v29 }
 0x63d   :  { %v1783_v32 = vpop.eup %1782  ;;  %v604_v33 = vpop.xlane.xlu2 %603 }
 0x63e   :  { %v611_v34 = vmul.f32 %v1783_v32, %v1779_v24  ;;  %1784 = vrcp.f32 %v604_v33 }
 0x640   :  { %1649 = vmatmul.msk.f32.vlgmr.msra.gmra.mxu2 %vm455_vm0, %v611_v34 }
 0x644   :  { %v1785_v35 = vpop.eup %1784 }
 0x645   :  { %v610_v36 = vmul.f32 %v1785_v35, %v1781_v26 }
 0x647   :  { %1648 = vmatmul.msk.f32.vlgmr.msra.gmra.mxu1 %vm455_vm0, %v610_v36 }
 0x6c3   :  { %v661_v37 = vpop.f32.mrf.mxu2 }
 0x6c4   :  { %668 = vrot.lane.b32.xlu2 %v661_v37, %s2704_s2  ;;  %v635_v38 = vpop.f32.mrf.mxu1  ;;  %v831_v37 = vld [vmem:[%s2664_s16 + $0x38] sm:$0xff] }
 0x6c5   :  { %666 = vrot.lane.b32.xlu1 %v635_v38, %s2704_s2  ;;  %850 = vmatpush.msrb.mxu1 %v831_v37  ;;  %v830_v38 = vld [vmem:[%s2664_s16 + $0x30] sm:$0xff] }
 0x6c7   :  { %851 = vmatpush.msrb.mxu1 %v830_v38 }
 0x6c9   :  { %852 = vmatpush.msrb.mxu1 %v829_v40 }
 0x6cb   :  { %853 = vmatpush.msrb.mxu1 %v828_v41 }
 0x6cd   :  { %854 = vmatpush.msrb.mxu1 %v827_v43 }
 0x6cf   :  { %855 = vmatpush.msrb.mxu1 %v826_v44 }
 0x71e   :  { %v669_v48 = vpop.permute.xlu2 %668 }
 0x71f   :  { %v673_v49 = vsel %vm399_vm15, %v527_v6, %v669_v48  ;;  %v769_v6 = vld [vmem:[%s2662_s14] sm:$0xff]  ;;  %v1747_v48 = vld [vmem:[#allocation10] ss:$0 sm:$0xff] }
 0x737   :  { %v667_v46 = vpop.permute.xlu1 %666 }
 0x738   :  { %v672_v47 = vsel %vm399_vm15, %v501_v7, %v667_v46  ;;  %v825_v46 = vld [vmem:[%s2664_s16 + $0x8] sm:$0xff] }
 0x739   :  { %1650 = vmatmul.msk.f32.vlgmr.msrb.gmra.mxu3 %vm288_vm6, %v672_v47  ;;  %v824_v47 = vld [vmem:[%s2664_s16] sm:$0xff]  ;;  %856 = vmatpush.msrb.mxu1 %v825_v46 }
 0x73b   :  { %857 = vmatpush.msrb.mxu1 %v824_v47  ;;  %v1749_v47 = vld [vmem:[%s2666_s18] ss:$0 sm:$0xff] }
 0x741   :  { %1651 = vmatmul.msk.f32.gmra.mxu3 %vm288_vm6, %v673_v49 }
 0x7bc   :  { %v705_v51 = vpop.f32.mrf.mxu3 }
 0x7bd   :  { %v706_v52 = vadd.f32 %v1744_v50, %v705_v51 }
 0x7bf   :  { %v711_v53 = vadd.f32 %v706_v52, %v2300_v18 }
 0x7c1   :  { %v715_v54 = vsel %vm288_vm6, %v711_v53, 0.0 }
 0x7c2   :  { %716 = vadd.xlane.f32.xlu0 %v715_v54 }
 0x7c4   :  { %v708_v55 = vpop.f32.mrf.mxu3 }
 0x7c5   :  { %v709_v56 = vadd.f32 %v1744_v50, %v708_v55 }
 0x7c7   :  { %v712_v57 = vadd.f32 %v709_v56, %v2304_v23  ;;  %v772_v23 = vld [vmem:[%s2662_s14 + $0x18] sm:$0xff] }
 0x7c8   :  { %795 = vmatpush.msrb.mxu0 %v772_v23 }
 0x7c9   :  { %v718_v58 = vsel %vm288_vm6, %v712_v57, 0.0 }
 0x7ca   :  { %719 = vadd.xlane.f32.xlu1 %v718_v58  ;;  %796 = vmatpush.msrb.mxu0 %v771_v4 }
 0x7cc   :  { %797 = vmatpush.msrb.mxu0 %v770_v5  ;;  %v1748_v5 = vld [vmem:[#allocation11] ss:$0 sm:$0xff] }
 0x7ce   :  { %798 = vmatpush.msrb.mxu0 %v769_v6 }
 0x835   :  { %v717_v59 = vpop.xlane.xlu0 %716 }
 0x836   :  { %v721_v60 = vmul.f32 %v717_v59, %v2280_v45 }
 0x838   :  { %v723_v61 = vsub.f32 %v711_v53, %v721_v60 }
 0x83a   :  { %v725_v62 = vmul.f32 %v723_v61, %v723_v61 }
 0x83c   :  { %v727_v63 = vsel %vm288_vm6, %v725_v62, 0.0 }
 0x83d   :  { %728 = vadd.xlane.f32.xlu2 %v727_v63  ;;  %v720_v0 = vpop.xlane.xlu1 %719 }
 0x83e   :  { %v722_v18 = vmul.f32 %v720_v0, %v2280_v45 }
 0x840   :  { %v724_v1 = vsub.f32 %v712_v57, %v722_v18 }
 0x842   :  { %v726_v2 = vmul.f32 %v724_v1, %v724_v1 }
 0x844   :  { %v730_v3 = vsel %vm288_vm6, %v726_v2, 0.0 }
 0x845   :  { %731 = vadd.xlane.f32.xlu0 %v730_v3 }
 0x8b0   :  { %v729_v7 = vpop.xlane.xlu2 %728 }
 0x8b1   :  { %v733_v8 = vmul.f32 %v729_v7, %v2280_v45 }
 0x8b3   :  { %v735_v9 = vadd.f32 1e-12, %v733_v8 }
 0x8b5   :  { %1786 = vrsqrt.f32 %v735_v9  ;;  %vm743_vm3 = vweird.f32 %v735_v9 }
 0x8b8   :  { %v732_v10 = vpop.xlane.xlu0 %731 }
 0x8b9   :  { %v734_v11 = vmul.f32 %v732_v10, %v2280_v45 }
 0x8bb   :  { %v1787_v12 = vpop.eup %1786  ;;  %v736_v13 = vadd.f32 1e-12, %v734_v11 }
 0x8bc   :  { %v738_v14 = vmul.f32 %v1787_v12, %v735_v9  ;;  %vm744_vm1 = vweird.f32 %v1787_v12 }
 0x8bd   :  { %1788 = vrsqrt.f32 %v736_v13  ;;  %vm745_vm4 = vmor %vm743_vm3, %vm744_vm1  ;;  %vm753_vm7 = vweird.f32 %v736_v13 }
 0x8be   :  { %v739_v15 = vmul.f32 %v1787_v12, %v738_v14 }
 0x8c0   :  { %v740_v16 = vmul.f32 0.5, %v739_v15 }
 0x8c2   :  { %v741_v17 = vsub.f32 1.5, %v740_v16 }
 0x8c3   :  { %v1789_v19 = vpop.eup %1788 }
 0x8c4   :  { %v742_v20 = vmul.f32 %v1787_v12, %v741_v17  ;;  %v748_v21 = vmul.f32 %v1789_v19, %v736_v13  ;;  %vm754_vm5 = vweird.f32 %v1789_v19 }
 0x8c5   :  { %vm755_vm8 = vmor %vm753_vm7, %vm754_vm5 }
 0x8c6   :  { %v746_v24 = vsel %vm745_vm4, %v1787_v12, %v742_v20  ;;  %v749_v25 = vmul.f32 %v1789_v19, %v748_v21 }
 0x8c7   :  { %v757_v26 = vmul.f32 %v746_v24, %v723_v61 }
 0x8c8   :  { %v750_v28 = vmul.f32 0.5, %v749_v25 }
 0x8c9   :  { %v762_v30 = vmul.f32 %v1745_v22, %v757_v26  ;;  %v1659_v26 = vld [vmem:[%s2709_s25 + $0x38] sm:$0xff] }
 0x8ca   :  { %v751_v31 = vsub.f32 1.5, %v750_v28  ;;  %951 = vmatpush.msrb.mxu2 %v1659_v26  ;;  %v1657_v28 = vld [vmem:[%s2709_s25 + $0x28] sm:$0xff] }
 0x8cb   :  { %v767_v29 = vadd.f32 %v1746_v27, %v762_v30  ;;  %v1656_v30 = vld [vmem:[%s2709_s25 + $0x20] sm:$0xff] }
 0x8cc   :  { %v752_v32 = vmul.f32 %v1789_v19, %v751_v31 }
 0x8cd   :  { %1652 = vmatmul.msk.f32.vlgmr.msrb.gmra.mxu0 %vm288_vm6, %v767_v29 }
 0x8ce   :  { %v756_v33 = vsel %vm755_vm8, %v1789_v19, %v752_v32 }
 0x8cf   :  { %v758_v34 = vmul.f32 %v756_v33, %v724_v1 }
 0x8d1   :  { %v763_v35 = vmul.f32 %v1745_v22, %v758_v34 }
 0x8d3   :  { %v768_v36 = vadd.f32 %v1746_v27, %v763_v35  ;;  %v1658_v27 = vld [vmem:[%s2709_s25 + $0x30] sm:$0xff] }
 0x8d4   :  { %952 = vmatpush.msrb.mxu2 %v1658_v27 }
 0x8d5   :  { %1653 = vmatmul.msk.f32.gmra.mxu0 %vm288_vm6, %v768_v36 }
 0x8d6   :  { %953 = vmatpush.msrb.mxu2 %v1657_v28 }
 0x8d8   :  { %954 = vmatpush.msrb.mxu2 %v1656_v30 }
 0x94a   :  { %v800_v49 = vpop.f32.mrf.mxu0 }
 0x94b   :  { %v801_v50 = vadd.f32 %v1747_v48, %v800_v49 }
 0x94d   :  { %v808_v51 = vmul.f32 0.044715, %v801_v50  ;;  %v806_v0 = vmul.f32 0.5, %v801_v50 }
 0x94f   :  { %v810_v52 = vmul.f32 %v808_v51, %v801_v50  ;;  %v1750_v51 = vld [vmem:[#allocation13] ss:$0 sm:$0xff] }
 0x951   :  { %v812_v53 = vmul.f32 %v810_v52, %v801_v50 }
 0x952   :  { %v803_v54 = vpop.f32.mrf.mxu0 }
 0x953   :  { %v814_v55 = vadd.f32 %v812_v53, %v801_v50  ;;  %v804_v56 = vadd.f32 %v1747_v48, %v803_v54 }
 0x955   :  { %v816_v57 = vmul.f32 0.7978846, %v814_v55  ;;  %v809_v58 = vmul.f32 0.044715, %v804_v56  ;;  %v807_v3 = vmul.f32 0.5, %v804_v56 }
 0x957   :  { %1790 = vtanh.f32 %v816_v57  ;;  %v811_v59 = vmul.f32 %v809_v58, %v804_v56 }
 0x959   :  { %v813_v60 = vmul.f32 %v811_v59, %v804_v56 }
 0x95b   :  { %v815_v61 = vadd.f32 %v813_v60, %v804_v56 }
 0x95d   :  { %v1791_v62 = vpop.eup %1790  ;;  %v817_v63 = vmul.f32 0.7978846, %v815_v61  ;;  %v1751_v61 = vld [vmem:[%s2710_s5 + $0x1] ss:$0 sm:$0xff] }
 0x95e   :  { %v820_v18 = vadd.f32 1.0, %v1791_v62 }
 0x95f   :  { %1792 = vtanh.f32 %v817_v63 }
 0x960   :  { %v822_v1 = vmul.f32 %v820_v18, %v806_v0 }
 0x962   :  { %1654 = vmatmul.msk.f32.vlgmr.msrb.gmra.mxu1 %vm254_vm2, %v822_v1 }
 0x965   :  { %v1793_v2 = vpop.eup %1792 }
 0x966   :  { %v821_v23 = vadd.f32 1.0, %v1793_v2 }
 0x968   :  { %v823_v4 = vmul.f32 %v821_v23, %v807_v3 }
 0x96a   :  { %1655 = vmatmul.msk.f32.gmra.mxu1 %vm254_vm2, %v823_v4 }
 0x9df   :  { %v859_v6 = vpop.f32.mrf.mxu1 }
 0x9e0   :  { %v860_v7 = vadd.f32 %v1748_v5, %v859_v6 }
 0x9e2   :  { %v865_v8 = vadd.f32 %v860_v7, %v767_v29 }
 0x9e4   :  { %v869_v9 = vsel %vm288_vm6, %v865_v8, 0.0 }
 0x9e5   :  { %870 = vadd.xlane.f32.xlu0 %v869_v9 }
 0x9e7   :  { %v862_v10 = vpop.f32.mrf.mxu1 }
 0x9e8   :  { %v863_v11 = vadd.f32 %v1748_v5, %v862_v10 }
 0x9ea   :  { %v866_v12 = vadd.f32 %v863_v11, %v768_v36 }
 0x9ec   :  { %v872_v13 = vsel %vm288_vm6, %v866_v12, 0.0 }
 0x9ed   :  { %873 = vadd.xlane.f32.xlu1 %v872_v13 }
 0xa58   :  { %v871_v14 = vpop.xlane.xlu0 %870 }
 0xa59   :  { %v875_v15 = vmul.f32 %v871_v14, %v2280_v45 }
 0xa5b   :  { %v877_v16 = vsub.f32 %v865_v8, %v875_v15 }
 0xa5d   :  { %v879_v17 = vmul.f32 %v877_v16, %v877_v16 }
 0xa5f   :  { %v881_v19 = vsel %vm288_vm6, %v879_v17, 0.0 }
 0xa60   :  { %v874_v20 = vpop.xlane.xlu1 %873  ;;  %882 = vadd.xlane.f32.xlu2 %v881_v19 }
 0xa61   :  { %v876_v21 = vmul.f32 %v874_v20, %v2280_v45 }
 0xa63   :  { %v878_v22 = vsub.f32 %v866_v12, %v876_v21 }
 0xa65   :  { %v880_v24 = vmul.f32 %v878_v22, %v878_v22 }
 0xa67   :  { %v884_v25 = vsel %vm288_vm6, %v880_v24, 0.0 }
 0xa68   :  { %885 = vadd.xlane.f32.xlu0 %v884_v25 }
 0xad3   :  { %v883_v31 = vpop.xlane.xlu2 %882 }
 0xad4   :  { %v887_v29 = vmul.f32 %v883_v31, %v2280_v45 }
 0xad6   :  { %v889_v32 = vadd.f32 1e-12, %v887_v29 }
 0xad8   :  { %1794 = vrsqrt.f32 %v889_v32  ;;  %vm897_vm10 = vweird.f32 %v889_v32 }
 0xadb   :  { %v886_v33 = vpop.xlane.xlu0 %885 }
 0xadc   :  { %v888_v34 = vmul.f32 %v886_v33, %v2280_v45 }
 0xade   :  { %v1795_v35 = vpop.eup %1794  ;;  %v890_v36 = vadd.f32 1e-12, %v888_v34 }
 0xadf   :  { %v892_v37 = vmul.f32 %v1795_v35, %v889_v32  ;;  %vm898_vm9 = vweird.f32 %v1795_v35 }
 0xae0   :  { %1796 = vrsqrt.f32 %v890_v36  ;;  %vm899_vm11 = vmor %vm897_vm10, %vm898_vm9  ;;  %vm907_vm13 = vweird.f32 %v890_v36 }
 0xae1   :  { %v893_v38 = vmul.f32 %v1795_v35, %v892_v37 }
 0xae3   :  { %v894_v40 = vmul.f32 0.5, %v893_v38 }
 0xae5   :  { %v895_v41 = vsub.f32 1.5, %v894_v40 }
 0xae6   :  { %v1797_v43 = vpop.eup %1796 }
 0xae7   :  { %v896_v44 = vmul.f32 %v1795_v35, %v895_v41  ;;  %v902_v46 = vmul.f32 %v1797_v43, %v890_v36  ;;  %vm908_vm12 = vweird.f32 %v1797_v43 }
 0xae8   :  { %vm909_vm14 = vmor %vm907_vm13, %vm908_vm12  ;;  %vm1500_vm12 = vcmask 1040384   ;;  %vm1571_vm13 = vcmask 123904  }
 0xae9   :  { %v900_v48 = vsel %vm899_vm11, %v1795_v35, %v896_v44  ;;  %v903_v49 = vmul.f32 %v1797_v43, %v902_v46 }
 0xaea   :  { %v911_v50 = vmul.f32 %v900_v48, %v877_v16 }
 0xaeb   :  { %v904_v52 = vmul.f32 0.5, %v903_v49 }
 0xaec   :  { %v916_v53 = vmul.f32 %v1749_v47, %v911_v50 }
 0xaed   :  { %v905_v54 = vsub.f32 1.5, %v904_v52 }
 0xaee   :  { %v2451_v55 = vadd.f32 %v1750_v51, %v916_v53 }
 0xaef   :  { %v906_v56 = vmul.f32 %v1797_v43, %v905_v54 }
 0xaf0   :  { %1661 = vmatmul.msk.f32.vlgmr.msrb.gmra.mxu2 %vm288_vm6, %v2451_v55 }
 0xaf1   :  { %v910_v57 = vsel %vm909_vm14, %v1797_v43, %v906_v56  ;;  %vm1618_vm14 = vcmask 269312  }
 0xaf2   :  { %v912_v58 = vmul.f32 %v910_v57, %v878_v22 }
 0xaf4   :  { %v917_v59 = vmul.f32 %v1749_v47, %v912_v58 }
 0xaf6   :  { %v2455_v60 = vadd.f32 %v1750_v51, %v917_v59 }
 0xaf8   :  { %1662 = vmatmul.msk.f32.gmra.mxu2 %vm288_vm6, %v2455_v60 }
 0xb73   :  { %v956_v62 = vpop.f32.mrf.mxu2 }
 0xb74   :  { %v2462_v63 = vadd.f32 %v1751_v61, %v956_v62 }
 0xb76   :  { %1096 = vrot.lane.b32.xlu0 %v2462_v63, %s2049_s3  ;;  %963 = vrot.lane.b32.xlu1 %v2462_v63, %s2047_s30 }
 0xb7b   :  { %v959_v0 = vpop.f32.mrf.mxu2 }
 0xb7c   :  { %v2468_v18 = vadd.f32 %v1751_v61, %v959_v0 }
 0xb7e   :  { %1094 = vrot.lane.b32.xlu1 %v2462_v63, %s2050_s29  ;;  %1124 = vrot.lane.b32.xlu0 %v2468_v18, %s2049_s3  ;;  %v1736_v44 = vpack.i.bf16 %v2468_v18, %v2462_v63 }
 0xb7f   :  { %990 = vrot.lane.b32.xlu2 %v2468_v18, %s2047_s30 }
 0xb87   :  { %1122 = vrot.lane.b32.xlu2 %v2468_v18, %s2050_s29 }
 0xbd9   :  { %v991_v1 = vpop.permute.xlu2 %990 }
 0xbda   :  { %1665 = vmatpush.xpose.msk.msra.mxu0 %vm399_vm15, %v991_v1  ;;  %v1677_v1 = vld [vmem:[%s2712_s12 + $0x30] sm:$0xff] }
 0xbdd   :  { %1666 = vmatmul.msk.f32.vlgmr.msra.gmra.mxu0 %vm399_vm15, %v2468_v18 }
 0xbe1   :  { %v1123_v5 = vpop.permute.xlu2 %1122 }
 0xbe8   :  { %v964_v2 = vpop.permute.xlu1 %963  ;;  %v1097_v3 = vpop.permute.xlu0 %1096 }
 0xbe9   :  { %1663 = vmatpush.xpose.msk.msra.mxu3 %vm399_vm15, %v964_v2  ;;  %1669 = vmatpush.xpose.msk.msrb.mxu0 %vm399_vm15, %v1097_v3  ;;  %v1676_v2 = vld [vmem:[%s2712_s12 + $0x28] sm:$0xff] }
 0xbec   :  { %1664 = vmatmul.msk.f32.vlgmr.msra.gmra.mxu3 %vm399_vm15, %v2462_v63 }
 0xbf0   :  { %v1095_v23 = vpop.permute.xlu1 %1094  ;;  %v1125_v4 = vpop.permute.xlu0 %1124 }
 0xbf1   :  { %1670 = vmatmul.msk.f32.vlgmr.msrb.gmra.mxu0 %vm399_vm15, %v1095_v23  ;;  %1671 = vmatpush.xpose.msk.msra.mxu1 %vm399_vm15, %v1125_v4 }
 0xbf4   :  { %1672 = vmatmul.msk.f32.vlgmr.msra.gmra.mxu1 %vm399_vm15, %v1123_v5 }
 0xc5a   :  { %v1013_v6 = vpop.f32.mrf.mxu0 }
 0xc5b   :  { %v1017_v7 = vmul.f32 0.25, %v1013_v6  ;;  %v1675_v6 = vld [vmem:[%s2712_s12 + $0x20] sm:$0xff] }
 0xc5d   :  { %v1019_v8 = vadd.f32 %v1017_v7, %v2324_v39 }
 0xc5f   :  { %v1023_v9 = vsel %vm455_vm0, %v1019_v8, -inf }
 0xc60   :  { %1024 = vmax.xlane.f32.xlu0 %v1023_v9 }
 0xc6e   :  { %v1119_v10 = vpop.f32.mrf.mxu0 }
 0xc6f   :  { %v1150_v11 = vmul.f32 0.25, %v1119_v10  ;;  %v986_v12 = vpop.f32.mrf.mxu3 }
 0xc70   :  { %v1016_v13 = vmul.f32 0.25, %v986_v12 }
 0xc71   :  { %v1147_v14 = vpop.f32.mrf.mxu1  ;;  %v1152_v15 = vadd.f32 %v1150_v11, %v2326_v42  ;;  %v1752_v11 = vld [vmem:[#allocation8 + $0x1] ss:$0 sm:$0xff] }
 0xc72   :  { %v1018_v16 = vadd.f32 %v1016_v13, %v2326_v42  ;;  %v1151_v19 = vmul.f32 0.25, %v1147_v14 }
 0xc73   :  { %v1154_v17 = vsel %vm455_vm0, %v1152_v15, -inf }
 0xc74   :  { %1155 = vmax.xlane.f32.xlu2 %v1154_v17  ;;  %v1020_v20 = vsel %vm455_vm0, %v1018_v16, -inf  ;;  %v1153_v21 = vadd.f32 %v1151_v19, %v2324_v39 }
 0xc75   :  { %1021 = vmax.xlane.f32.xlu1 %v1020_v20 }
 0xc76   :  { %v1157_v22 = vsel %vm455_vm0, %v1153_v21, -inf }
 0xc7d   :  { %1158 = vmax.xlane.f32.xlu1 %v1157_v22 }
 0xcd3   :  { %v1025_v24 = vpop.xlane.xlu0 %1024 }
 0xcd4   :  { %v1027_v25 = vsub.f32 %v1019_v8, %v1025_v24 }
 0xcd6   :  { %v1030_v26 = vmul.f32 1.442695, %v1027_v25 }
 0xcd8   :  { %1798 = vpow2.f32 %v1030_v26 }
 0xcde   :  { %v1799_v27 = vpop.eup %1798 }
 0xcdf   :  { %v1035_v28 = vsel %vm455_vm0, %v1799_v27, 0.0 }
 0xce0   :  { %1036 = vadd.xlane.f32.xlu2 %v1035_v28 }
 0xce7   :  { %v1156_v42 = vpop.xlane.xlu2 %1155 }
 0xce8   :  { %v1160_v30 = vsub.f32 %v1152_v15, %v1156_v42  ;;  %v1022_v31 = vpop.xlane.xlu1 %1021 }
 0xce9   :  { %v1026_v29 = vsub.f32 %v1018_v16, %v1022_v31  ;;  %v1685_v31 = vld [vmem:[%s2662_s14 + $0x30] sm:$0xff] }
 0xcea   :  { %v1162_v32 = vmul.f32 1.442695, %v1160_v30 }
 0xceb   :  { %v1028_v33 = vmul.f32 1.442695, %v1026_v29  ;;  %v1684_v29 = vld [vmem:[%s2662_s14 + $0x28] sm:$0xff] }
 0xcec   :  { %1800 = vpow2.f32 %v1162_v32  ;;  %v1683_v32 = vld [vmem:[%s2662_s14 + $0x20] sm:$0xff] }
 0xced   :  { %1802 = vpow2.f32 %v1028_v33 }
 0xcf0   :  { %v1159_v39 = vpop.xlane.xlu1 %1158 }
 0xcf1   :  { %v1161_v34 = vsub.f32 %v1153_v21, %v1159_v39 }
 0xcf2   :  { %v1801_v35 = vpop.eup %1800 }
 0xcf3   :  { %v1803_v36 = vpop.eup %1802  ;;  %v1164_v37 = vmul.f32 1.442695, %v1161_v34  ;;  %v1166_v38 = vsel %vm455_vm0, %v1801_v35, 0.0 }
 0xcf4   :  { %1167 = vadd.xlane.f32.xlu1 %v1166_v38  ;;  %v1032_v40 = vsel %vm455_vm0, %v1803_v36, 0.0 }
 0xcf5   :  { %1804 = vpow2.f32 %v1164_v37  ;;  %1033 = vadd.xlane.f32.xlu0 %v1032_v40 }
 0xcfb   :  { %v1805_v41 = vpop.eup %1804 }
 0xcfc   :  { %v1169_v43 = vsel %vm455_vm0, %v1805_v41, 0.0 }
 0xcfd   :  { %1170 = vadd.xlane.f32.xlu2 %v1169_v43 }
 0xd09   :  { %1737 = vrot.lane.b32.xlu0 %v1736_v44, %s2048_s6 }
 0xd0d   :  { %1176 = vrot.lane.b32.xlu1 %v2462_v63, %s2051_s11 }
 0xd15   :  { %1202 = vrot.lane.b32.xlu2 %v2468_v18, %s2051_s11  ;;  %v1678_v18 = vld [vmem:[%s2712_s12 + $0x38] sm:$0xff] }
 0xd16   :  { %1266 = vmatpush.msra.mxu0 %v1678_v18  ;;  %v1696_v18 = vld [vmem:[%s2664_s16 + $0x78] sm:$0xff] }
 0xd18   :  { %1267 = vmatpush.msra.mxu0 %v1677_v1  ;;  %v1695_v1 = vld [vmem:[%s2664_s16 + $0x70] sm:$0xff] }
 0xd1a   :  { %1268 = vmatpush.msra.mxu0 %v1676_v2  ;;  %v1694_v2 = vld [vmem:[%s2664_s16 + $0x68] sm:$0xff] }
 0xd1c   :  { %1269 = vmatpush.msra.mxu0 %v1675_v6  ;;  %v1689_v6 = vld [vmem:[%s2664_s16 + $0x40] sm:$0xff] }
 0xd53   :  { %v1037_v46 = vpop.xlane.xlu2 %1036 }
 0xd54   :  { %1806 = vrcp.f32 %v1037_v46 }
 0xd5a   :  { %v1807_v50 = vpop.eup %1806 }
 0xd5b   :  { %v1041_v56 = vmul.f32 %v1807_v50, %v1799_v27 }
 0xd67   :  { %v1168_v49 = vpop.xlane.xlu1 %1167 }
 0xd68   :  { %v1034_v47 = vpop.xlane.xlu0 %1033 }
 0xd69   :  { %1808 = vrcp.f32 %v1034_v47 }
 0xd6a   :  { %1810 = vrcp.f32 %v1168_v49  ;;  %v1753_v49 = vld [vmem:[%s2713_s8 + $0x1] ss:$0 sm:$0xff] }
 0xd6f   :  { %v1809_v51 = vpop.eup %1808 }
 0xd70   :  { %v1171_v48 = vpop.xlane.xlu2 %1170  ;;  %v1040_v57 = vmul.f32 %v1809_v51, %v1803_v36  ;;  %v1811_v61 = vpop.eup %1810 }
 0xd71   :  { %1812 = vrcp.f32 %v1171_v48  ;;  %v1174_v63 = vmul.f32 %v1811_v61, %v1801_v35 }
 0xd77   :  { %v1813_v62 = vpop.eup %1812 }
 0xd78   :  { %v1203_v58 = vpop.permute.xlu2 %1202  ;;  %v1175_v0 = vmul.f32 %v1813_v62, %v1805_v41 }
 0xd7b   :  { %v1738_v52 = vpop.permute.xlu0 %1737 }
 0xd7c   :  { %v1740_v53 = vunpack.i.h.bf16 %v1738_v52  ;;  %v1739_v54 = vunpack.i.l.bf16 %v1738_v52 }
 0xd7e   :  { %1063 = vmatpush.msra.mxu2 %v1739_v54  ;;  %1089 = vmatpush.msrb.mxu3 %v1740_v53  ;;  %v1754_v53 = vld [vmem:[%s2661_s13 + $0x1] ss:$0 sm:$0xff] }
 0xd7f   :  { %v1177_v59 = vpop.permute.xlu1 %1176  ;;  %1667 = vmatmul.msk.f32.vlgmr.msra.gmra.mxu2 %vm455_vm0, %v1040_v57  ;;  %1668 = vmatmul.msk.f32.vlgmr.msrb.gmra.mxu3 %vm455_vm0, %v1041_v56 }
 0xd80   :  { %1223 = vmatpush.msra.mxu3 %v1203_v58  ;;  %1197 = vmatpush.msrb.mxu2 %v1177_v59 }
 0xd82   :  { %1422 = vmatpush.msra.mxu2 %v1696_v18 }
 0xd84   :  { %1423 = vmatpush.msra.mxu2 %v1695_v1 }
 0xd86   :  { %1424 = vmatpush.msra.mxu2 %v1694_v2 }
 0xd87   :  { %1673 = vmatmul.msk.f32.vlgmr.msrb.gmra.mxu2 %vm455_vm0, %v1174_v63  ;;  %1674 = vmatmul.msk.f32.vlgmr.msra.gmra.mxu3 %vm455_vm0, %v1175_v0 }
 0xe02   :  { %v1065_v3 = vpop.f32.mrf.mxu2  ;;  %v1091_v23 = vpop.f32.mrf.mxu3 }
 0xe0a   :  { %v1199_v4 = vpop.f32.mrf.mxu2  ;;  %v1225_v5 = vpop.f32.mrf.mxu3 }
 0xe0b   :  { %1230 = vrot.lane.b32.xlu0 %v1199_v4, %s2704_s2  ;;  %v1691_v4 = vld [vmem:[%s2664_s16 + $0x50] sm:$0xff] }
 0xe13   :  { %1232 = vrot.lane.b32.xlu0 %v1225_v5, %s2704_s2  ;;  %v1690_v5 = vld [vmem:[%s2664_s16 + $0x48] sm:$0xff] }
 0xe7d   :  { %v1231_v7 = vpop.permute.xlu0 %1230 }
 0xe7e   :  { %v1236_v8 = vsel %vm399_vm15, %v1065_v3, %v1231_v7  ;;  %v1693_v3 = vld [vmem:[%s2664_s16 + $0x60] sm:$0xff]  ;;  %v1755_v7 = vld [vmem:[#allocation10 + $0x1] ss:$0 sm:$0xff] }
 0xe7f   :  { %1679 = vmatmul.msk.f32.vlgmr.msra.gmra.mxu0 %vm288_vm6, %v1236_v8  ;;  %1425 = vmatpush.msra.mxu2 %v1693_v3 }
 0xe85   :  { %v1233_v9 = vpop.permute.xlu0 %1232 }
 0xe86   :  { %v1237_v10 = vsel %vm399_vm15, %v1091_v23, %v1233_v9  ;;  %v1692_v23 = vld [vmem:[%s2664_s16 + $0x58] sm:$0xff] }
 0xe87   :  { %1680 = vmatmul.msk.f32.gmra.mxu0 %vm288_vm6, %v1237_v10  ;;  %1426 = vmatpush.msra.mxu2 %v1692_v23 }
 0xe89   :  { %1427 = vmatpush.msra.mxu2 %v1691_v4 }
 0xe8b   :  { %1428 = vmatpush.msra.mxu2 %v1690_v5 }
 0xe8d   :  { %1429 = vmatpush.msra.mxu2 %v1689_v6 }
 0xefc   :  { %v1271_v12 = vpop.f32.mrf.mxu0 }
 0xefd   :  { %v1272_v13 = vadd.f32 %v1752_v11, %v1271_v12 }
 0xeff   :  { %v1277_v14 = vadd.f32 %v1272_v13, %v2451_v55 }
 0xf01   :  { %v1283_v15 = vsel %vm288_vm6, %v1277_v14, 0.0 }
 0xf02   :  { %1284 = vadd.xlane.f32.xlu1 %v1283_v15 }
 0xf04   :  { %v1274_v16 = vpop.f32.mrf.mxu0 }
 0xf05   :  { %v1275_v17 = vadd.f32 %v1752_v11, %v1274_v16 }
 0xf07   :  { %v1278_v19 = vadd.f32 %v1275_v17, %v2455_v60  ;;  %v1686_v60 = vld [vmem:[%s2662_s14 + $0x38] sm:$0xff]  ;;  %s2052_s14 = smov 33  }
 0xf08   :  { %1365 = vmatpush.msrb.mxu1 %v1686_v60  ;;  %v1756_v60 = vld [vmem:[#allocation11 + $0x1] ss:$0 sm:$0xff] }
 0xf09   :  { %v1286_v20 = vsel %vm288_vm6, %v1278_v19, 0.0 }
 0xf0a   :  { %1287 = vadd.xlane.f32.xlu2 %v1286_v20  ;;  %1366 = vmatpush.msrb.mxu1 %v1685_v31 }
 0xf0c   :  { %1367 = vmatpush.msrb.mxu1 %v1684_v29 }
 0xf0e   :  { %1368 = vmatpush.msrb.mxu1 %v1683_v32 }
 0xf75   :  { %v1285_v21 = vpop.xlane.xlu1 %1284 }
 0xf76   :  { %v1289_v22 = vmul.f32 %v1285_v21, %v2280_v45 }
 0xf78   :  { %v1291_v24 = vsub.f32 %v1277_v14, %v1289_v22 }
 0xf7a   :  { %v1293_v25 = vmul.f32 %v1291_v24, %v1291_v24 }
 0xf7c   :  { %v1295_v26 = vsel %vm288_vm6, %v1293_v25, 0.0 }
 0xf7d   :  { %1296 = vadd.xlane.f32.xlu0 %v1295_v26  ;;  %v1288_v27 = vpop.xlane.xlu2 %1287 }
 0xf7e   :  { %v1290_v55 = vmul.f32 %v1288_v27, %v2280_v45 }
 0xf80   :  { %v1292_v28 = vsub.f32 %v1278_v19, %v1290_v55 }
 0xf82   :  { %v1294_v42 = vmul.f32 %v1292_v28, %v1292_v28 }
 0xf84   :  { %v1298_v30 = vsel %vm288_vm6, %v1294_v42, 0.0 }
 0xf85   :  { %1299 = vadd.xlane.f32.xlu2 %v1298_v30 }
 0xff0   :  { %v1297_v33 = vpop.xlane.xlu0 %1296 }
 0xff1   :  { %v1301_v39 = vmul.f32 %v1297_v33, %v2280_v45 }
 0xff3   :  { %v1303_v34 = vadd.f32 1e-12, %v1301_v39 }
 0xff5   :  { %1814 = vrsqrt.f32 %v1303_v34  ;;  %vm1311_vm0 = vweird.f32 %v1303_v34 }
 0xff8   :  { %v1300_v35 = vpop.xlane.xlu2 %1299 }
 0xff9   :  { %v1302_v36 = vmul.f32 %v1300_v35, %v2280_v45 }
 0xffb   :  { %v1815_v37 = vpop.eup %1814  ;;  %v1304_v38 = vadd.f32 1e-12, %v1302_v36 }
 0xffc   :  { %v1306_v40 = vmul.f32 %v1815_v37, %v1303_v34  ;;  %vm1312_vm15 = vweird.f32 %v1815_v37 }
 0xffd   :  { %1816 = vrsqrt.f32 %v1304_v38  ;;  %vm1313_vm1 = vmor %vm1311_vm0, %vm1312_vm15  ;;  %vm1321_vm4 = vweird.f32 %v1304_v38  ;;  %vm1620_vm15 = vcmask 531456  }
 0xffe   :  { %v1307_v41 = vmul.f32 %v1815_v37, %v1306_v40 }
0x1000   :  { %v1308_v43 = vmul.f32 0.5, %v1307_v41 }
0x1002   :  { %v1309_v44 = vsub.f32 1.5, %v1308_v43 }
0x1003   :  { %v1817_v46 = vpop.eup %1816 }
0x1004   :  { %v1310_v47 = vmul.f32 %v1815_v37, %v1309_v44  ;;  %v1316_v48 = vmul.f32 %v1817_v46, %v1304_v38  ;;  %vm1322_vm3 = vweird.f32 %v1817_v46 }
0x1005   :  { %vm1323_vm5 = vmor %vm1321_vm4, %vm1322_vm3 }
0x1006   :  { %v1314_v50 = vsel %vm1313_vm1, %v1815_v37, %v1310_v47  ;;  %v1317_v51 = vmul.f32 %v1817_v46, %v1316_v48 }
0x1007   :  { %v1325_v52 = vmul.f32 %v1314_v50, %v1291_v24 }
0x1008   :  { %v1318_v54 = vmul.f32 0.5, %v1317_v51 }
0x1009   :  { %v1330_v56 = vmul.f32 %v1753_v49, %v1325_v52  ;;  %v1505_v52 = vld [vmem:[%s2668_s20 + $0x18] sm:$0xff] }
0x100a   :  { %v1319_v57 = vsub.f32 1.5, %v1318_v54  ;;  %1525 = vmatpush.msrb.mxu3 %v1505_v52 }
0x100b   :  { %v1335_v58 = vadd.f32 %v1754_v53, %v1330_v56  ;;  %v1503_v56 = vld [vmem:[%s2668_s20 + $0x8] sm:$0xff] }
0x100c   :  { %v1320_v59 = vmul.f32 %v1817_v46, %v1319_v57  ;;  %v1502_v57 = vld [vmem:[%s2668_s20] sm:$0xff] }
0x100d   :  { %1687 = vmatmul.msk.f32.vlgmr.msrb.gmra.mxu1 %vm288_vm6, %v1335_v58 }
0x100e   :  { %v1324_v61 = vsel %vm1323_vm5, %v1817_v46, %v1320_v59 }
0x100f   :  { %v1326_v62 = vmul.f32 %v1324_v61, %v1292_v28 }
0x1011   :  { %v1331_v63 = vmul.f32 %v1753_v49, %v1326_v62 }
0x1013   :  { %v1336_v0 = vadd.f32 %v1754_v53, %v1331_v63  ;;  %v1504_v53 = vld [vmem:[%s2668_s20 + $0x10] sm:$0xff] }
0x1014   :  { %1526 = vmatpush.msrb.mxu3 %v1504_v53 }
0x1015   :  { %1688 = vmatmul.msk.f32.gmra.mxu1 %vm288_vm6, %v1336_v0 }
0x1016   :  { %1527 = vmatpush.msrb.mxu3 %v1503_v56 }
0x1018   :  { %1528 = vmatpush.msrb.mxu3 %v1502_v57 }
0x108a   :  { %v1370_v8 = vpop.f32.mrf.mxu1 }
0x108b   :  { %v1371_v9 = vadd.f32 %v1755_v7, %v1370_v8 }
0x108d   :  { %v1378_v10 = vmul.f32 0.044715, %v1371_v9  ;;  %v1376_v25 = vmul.f32 0.5, %v1371_v9 }
0x108f   :  { %v1380_v11 = vmul.f32 %v1378_v10, %v1371_v9 }
0x1091   :  { %v1382_v12 = vmul.f32 %v1380_v11, %v1371_v9 }
0x1092   :  { %v1373_v13 = vpop.f32.mrf.mxu1 }
0x1093   :  { %v1384_v14 = vadd.f32 %v1382_v12, %v1371_v9  ;;  %v1374_v15 = vadd.f32 %v1755_v7, %v1373_v13 }
0x1095   :  { %v1386_v16 = vmul.f32 0.7978846, %v1384_v14  ;;  %v1379_v17 = vmul.f32 0.044715, %v1374_v15  ;;  %v1377_v28 = vmul.f32 0.5, %v1374_v15 }
0x1096   :  { %v1758_v14 = vld [vmem:[#allocation13 + $0x1] ss:$0 sm:$0xff] }
0x1097   :  { %1818 = vtanh.f32 %v1386_v16  ;;  %v1381_v19 = vmul.f32 %v1379_v17, %v1374_v15 }
0x1099   :  { %v1383_v20 = vmul.f32 %v1381_v19, %v1374_v15 }
0x109b   :  { %v1385_v21 = vadd.f32 %v1383_v20, %v1374_v15  ;;  %v1537_v20 = vld [vmem:[%s2670_s22 + $0x18] sm:$0xff] }
0x109c   :  { %1557 = vmatpush.msra.mxu3 %v1537_v20 }
0x109d   :  { %v1819_v22 = vpop.eup %1818  ;;  %v1387_v24 = vmul.f32 0.7978846, %v1385_v21  ;;  %v1583_v21 = vld [vmem:[%s2674_s26 + $0x18] sm:$0xff] }
0x109e   :  { %v1390_v26 = vadd.f32 1.0, %v1819_v22  ;;  %v1536_v22 = vld [vmem:[%s2670_s22 + $0x10] sm:$0xff]  ;;  %1600 = vmatpush.msrb.mxu0 %v1583_v21 }
0x109f   :  { %1820 = vtanh.f32 %v1387_v24  ;;  %v1582_v24 = vld [vmem:[%s2674_s26 + $0x10] sm:$0xff]  ;;  %1558 = vmatpush.msra.mxu3 %v1536_v22 }
0x10a0   :  { %v1392_v27 = vmul.f32 %v1390_v26, %v1376_v25  ;;  %v1535_v25 = vld [vmem:[%s2670_s22 + $0x8] sm:$0xff]  ;;  %1601 = vmatpush.msrb.mxu0 %v1582_v24 }
0x10a1   :  { %v1581_v26 = vld [vmem:[%s2674_s26 + $0x8] sm:$0xff]  ;;  %1559 = vmatpush.msra.mxu3 %v1535_v25 }
0x10a2   :  { %1697 = vmatmul.msk.f32.vlgmr.msra.gmra.mxu2 %vm254_vm2, %v1392_v27  ;;  %v1534_v27 = vld [vmem:[%s2670_s22] sm:$0xff]  ;;  %1602 = vmatpush.msrb.mxu0 %v1581_v26 }
0x10a3   :  { %1560 = vmatpush.msra.mxu3 %v1534_v27 }
0x10a5   :  { %v1821_v55 = vpop.eup %1820 }
0x10a6   :  { %v1391_v42 = vadd.f32 1.0, %v1821_v55  ;;  %v1580_v55 = vld [vmem:[%s2674_s26] sm:$0xff] }
0x10a7   :  { %1603 = vmatpush.msrb.mxu0 %v1580_v55 }
0x10a8   :  { %v1393_v30 = vmul.f32 %v1391_v42, %v1377_v28  ;;  %v1759_v28 = vld [vmem:[%s2669_s21] ss:$0 sm:$0xff] }
0x10aa   :  { %1698 = vmatmul.msk.f32.gmra.mxu2 %vm254_vm2, %v1393_v30 }
0x1125   :  { %v1431_v31 = vpop.f32.mrf.mxu2 }
0x1126   :  { %v1432_v29 = vadd.f32 %v1756_v60, %v1431_v31  ;;  %v1760_v31 = vld [vmem:[#allocation14] ss:$0 sm:$0xff] }
0x1128   :  { %v1437_v32 = vadd.f32 %v1432_v29, %v1335_v58 }
0x112a   :  { %v1443_v33 = vsel %vm288_vm6, %v1437_v32, 0.0 }
0x112b   :  { %1444 = vadd.xlane.f32.xlu0 %v1443_v33  ;;  %v1761_v33 = vld [vmem:[%s2671_s23] ss:$0 sm:$0xff] }
0x112d   :  { %v1434_v39 = vpop.f32.mrf.mxu2 }
0x112e   :  { %v1435_v34 = vadd.f32 %v1756_v60, %v1434_v39 }
0x1130   :  { %v1438_v35 = vadd.f32 %v1435_v34, %v1336_v0 }
0x1132   :  { %v1446_v36 = vsel %vm288_vm6, %v1438_v35, 0.0 }
0x1133   :  { %1447 = vadd.xlane.f32.xlu1 %v1446_v36 }
0x119e   :  { %v1445_v37 = vpop.xlane.xlu0 %1444 }
0x119f   :  { %v1449_v38 = vmul.f32 %v1445_v37, %v2280_v45 }
0x11a1   :  { %v1451_v40 = vsub.f32 %v1437_v32, %v1449_v38 }
0x11a3   :  { %v1453_v41 = vmul.f32 %v1451_v40, %v1451_v40 }
0x11a5   :  { %v1455_v43 = vsel %vm288_vm6, %v1453_v41, 0.0  ;;  %v1763_v41 = vld [vmem:[#allocation2] ss:$0 sm:$0xff] }
0x11a6   :  { %v1448_v44 = vpop.xlane.xlu1 %1447  ;;  %1456 = vadd.xlane.f32.xlu1 %v1455_v43 }
0x11a7   :  { %v1450_v46 = vmul.f32 %v1448_v44, %v2280_v45 }
0x11a9   :  { %v1452_v47 = vsub.f32 %v1438_v35, %v1450_v46  ;;  %v1762_v35 = vld [vmem:[%s2672_s24] ss:$0 sm:$0xff] }
0x11ab   :  { %v1454_v48 = vmul.f32 %v1452_v47, %v1452_v47 }
0x11ad   :  { %v1458_v49 = vsel %vm288_vm6, %v1454_v48, 0.0 }
0x11ae   :  { %1459 = vadd.xlane.f32.xlu2 %v1458_v49 }
0x1219   :  { %v1457_v50 = vpop.xlane.xlu1 %1456 }
0x121a   :  { %v1461_v51 = vmul.f32 %v1457_v50, %v2280_v45 }
0x121c   :  { %v1463_v54 = vadd.f32 1e-12, %v1461_v51 }
0x121e   :  { %1822 = vrsqrt.f32 %v1463_v54  ;;  %vm1471_vm7 = vweird.f32 %v1463_v54 }
0x1221   :  { %v1460_v58 = vpop.xlane.xlu2 %1459 }
0x1222   :  { %v1462_v59 = vmul.f32 %v1460_v58, %v2280_v45  ;;  %v1757_v45 = vld [vmem:[%s2666_s18 + $0x1] ss:$0 sm:$0xff] }
0x1224   :  { %v1823_v61 = vpop.eup %1822  ;;  %v1464_v62 = vadd.f32 1e-12, %v1462_v59 }
0x1225   :  { %v1466_v63 = vmul.f32 %v1823_v61, %v1463_v54  ;;  %vm1472_vm2 = vweird.f32 %v1823_v61 }
0x1226   :  { %1824 = vrsqrt.f32 %v1464_v62  ;;  %vm1473_vm8 = vmor %vm1471_vm7, %vm1472_vm2  ;;  %vm1481_vm10 = vweird.f32 %v1464_v62 }
0x1227   :  { %v1467_v0 = vmul.f32 %v1823_v61, %v1466_v63 }
0x1229   :  { %v1468_v18 = vmul.f32 0.5, %v1467_v0 }
0x122b   :  { %v1469_v1 = vsub.f32 1.5, %v1468_v18 }
0x122c   :  { %v1825_v2 = vpop.eup %1824 }
0x122d   :  { %v1476_v3 = vmul.f32 %v1825_v2, %v1464_v62  ;;  %v1470_v23 = vmul.f32 %v1823_v61, %v1469_v1  ;;  %vm1482_vm9 = vweird.f32 %v1825_v2 }
0x122e   :  { %vm1483_vm11 = vmor %vm1481_vm10, %vm1482_vm9 }
0x122f   :  { %v1477_v4 = vmul.f32 %v1825_v2, %v1476_v3  ;;  %v1474_v6 = vsel %vm1473_vm8, %v1823_v61, %v1470_v23 }
0x1230   :  { %v1485_v9 = vmul.f32 %v1474_v6, %v1451_v40 }
0x1231   :  { %v1478_v5 = vmul.f32 0.5, %v1477_v4 }
0x1232   :  { %v1490_v12 = vmul.f32 %v1757_v45, %v1485_v9 }
0x1233   :  { %v1479_v7 = vsub.f32 1.5, %v1478_v5 }
0x1234   :  { %v1495_v16 = vadd.f32 %v1758_v14, %v1490_v12 }
0x1235   :  { %v1480_v8 = vmul.f32 %v1825_v2, %v1479_v7 }
0x1237   :  { %v1484_v10 = vsel %vm1483_vm11, %v1825_v2, %v1480_v8 }
0x1238   :  { %v1486_v11 = vmul.f32 %v1484_v10, %v1452_v47 }
0x123a   :  { %v1491_v13 = vmul.f32 %v1757_v45, %v1486_v11 }
0x123c   :  { %v1496_v15 = vadd.f32 %v1758_v14, %v1491_v13 }
0x123e   :  { %v1498_v17 = vrot.slane %v1496_v15, 7 }
0x1240   :  { %v1501_v19 = vsel %vm1500_vm12, %v1495_v16, %v1498_v17 }
0x1241   :  { %1700 = vmatmul.msk.f32.vlgmr.msrb.gmra.mxu3 %vm288_vm6, %v1501_v19 }
0x12c4   :  { %v1530_v42 = vpop.f32.mrf.mxu3 }
0x12c5   :  { %v1531_v30 = vadd.f32 %v1759_v28, %v1530_v42 }
0x12c7   :  { %1826 = vtanh.f32 %v1531_v30 }
0x12cd   :  { %v1827_v60 = vpop.eup %1826 }
0x12ce   :  { %1613 = vrot.lane.b32.xlu1 %v1827_v60, %s2052_s14  ;;  %1701 = vmatmul.msk.f32.vlgmr.msra.gmra.mxu3 %vm288_vm6, %v1827_v60 }
0x12cf   :  { %1702 = vmatmul.msk.f32.vlgmr.msrb.gmra.mxu0 %vm288_vm6, %v1827_v60  ;;  %vm1616_vm6 = vcmask 7168  }
0x1340   :  { %v1614_v47 = vpop.permute.xlu1 %1613 }
0x134c   :  { %v1605_v29 = vpop.f32.mrf.mxu0 }
0x134d   :  { %v1606_v32 = vadd.f32 %v1760_v31, %v1605_v29 }
0x134f   :  { %1828 = vtanh.f32 %v1606_v32 }
0x1351   :  { %v1562_v39 = vpop.f32.mrf.mxu3 }
0x1352   :  { %v1563_v34 = vadd.f32 %v1761_v33, %v1562_v39 }
0x1354   :  { %v1565_v36 = vmax.f32 %v1563_v34, 0.0 }
0x1355   :  { %v1829_v37 = vpop.eup %1828 }
0x1356   :  { %1610 = vrot.lane.b32.xlu2 %v1829_v37, %s2035_s4  ;;  %v1570_v38 = vmul.f32 %v1762_v35, %v1565_v36 }
0x1358   :  { %v1572_v40 = vsel %vm1571_vm13, %v1570_v38, 0.0 }
0x1359   :  { %1573 = vadd.xlane.f32.xlu0 %v1572_v40 }
0x13b0   :  { %v1611_v46 = vpop.permute.xlu2 %1610 }
0x13cc   :  { %v1574_v43 = vpop.xlane.xlu0 %1573 }
0x13cd   :  { %v1579_v44 = vadd.f32 %v1763_v41, %v1574_v43 }
0x13cf   :  { %v1617_v48 = vsel %vm1616_vm6, %v1579_v44, %v1611_v46 }
0x13d0   :  { %v1619_v49 = vsel %vm1618_vm14, %v1617_v48, %v1614_v47 }
0x13d1   :  { %v1621_v50 = vsel %vm1620_vm15, %v1619_v49, 0.0 }
0x13d2   :  { %1622 = vst [vmem:[%s2714_s19] sm:$0x3] %v1621_v50 }
0x13d3   :  { %1627 = vsyncpa [#allocation4], 1 }
0x13d4   :  { %1628 = vsyncpa [#allocation6], 1 }
0x13d5   :  { %1629 = vsyncpa [#allocation9], 1 }
0x13d6   :  { %1630 = vsyncpa [#allocation12], 1 }
0x13d7   :  { %1631 = vsyncpa [#allocation15], 1 }

</bundles_post_ra>
